<compile_context>
chip_gen: v7x
topology: tpu7x:2x2x1
jax: 0.10.0
libtpu: 0.0.40
codegen_flags: <defaults>
</compile_context>

<pallas_src>
import jax
import jax.numpy as jnp
from jax.experimental import pallas as pl
from jax.experimental.pallas import tpu as pltpu

# ---------------- config (scaled-down DistilBERT) ----------------
VOCAB = 100
MAX_POS = 16
HIDDEN = 128            # stands in for 768
N_HEADS = 2             # stands in for 12
D_HEAD = HIDDEN // N_HEADS
D_PAD = 128             # per-head Q/K/V zero-padded to a full 128-lane tile
QKVP = 3 * N_HEADS * D_PAD
FFN = 256               # stands in for 3072
N_LAYERS = 2            # stands in for 6 (>=2 so hidden_states[-2] != last layer)
N_USED = N_LAYERS - 1   # last encoder layer is dead code for this head
N_CLASSES = 2
CLS_PAD = 128           # lane-dense padding for the classifier output
LN_EPS = 1e-12


# ---------------- in-kernel helpers (traced jnp ops) ----------------
def _ln(x, g, b, eps=LN_EPS):
    """f32 LayerNorm over the last axis; g, b broadcast as (1, H)."""
    mu = jnp.mean(x, axis=-1, keepdims=True)
    var = jnp.mean((x - mu) ** 2, axis=-1, keepdims=True)
    return (x - mu) * jax.lax.rsqrt(var + eps) * g + b


def _mm(a, w_bf16, bias=None):
    """a (f32/bf16) @ w (bf16) on the MXU with f32 accumulation, + optional bias."""
    out = jnp.dot(a.astype(jnp.bfloat16), w_bf16, preferred_element_type=jnp.float32)
    return out if bias is None else out + bias


# ---------------- the single fused kernel ----------------
def _forward_kernel(emb_ref, mask_ref,
                    embg_ref, embb_ref,
                    wqkv_ref, bqkv_ref, wo_ref, bo_ref, sag_ref, sab_ref,
                    w1_ref, b1_ref, w2_ref, b2_ref, og_ref, ob_ref,
                    prew_ref, preb_ref, clsw_ref, clsb_ref,
                    out_ref):
    """Full forward for ONE batch row: emb LN -> layers -> CLS -> classifier."""
    # embedding LayerNorm (no residual)
    x = _ln(emb_ref[0].astype(jnp.float32), embg_ref[...], embb_ref[...])   # (S, H)
    S = x.shape[0]

    # hoist the (1,S)->(S,S) mask broadcast out of the head/layer loops
    mask2d = jnp.broadcast_to(mask_ref[0], (S, S))                          # (S, S) f32

    for l in range(N_USED):          # last encoder layer never computed (DCE)
        # fused Q|K|V projection; 1/sqrt(D_HEAD) already folded into Q weights
        qkv = _mm(x, wqkv_ref[l], bqkv_ref[l])                              # (S, QKVP) f32
        qkv_bf = qkv.astype(jnp.bfloat16)                                   # cast once
        wo_l = wo_ref[l]                                                    # (N_HEADS*D_PAD, H)

        # per-head attention; heads live on 128-lane boundaries (no relayout)
        attn = bo_ref[l]                                                    # (1, H), broadcasts
        for hh in range(N_HEADS):
            q = qkv_bf[:, hh * D_PAD:(hh + 1) * D_PAD]
            k = qkv_bf[:, N_HEADS * D_PAD + hh * D_PAD:
                          N_HEADS * D_PAD + (hh + 1) * D_PAD]
            v = qkv_bf[:, 2 * N_HEADS * D_PAD + hh * D_PAD:
                          2 * N_HEADS * D_PAD + (hh + 1) * D_PAD]
            s = jax.lax.dot_general(q, k, (((1,), (1,)), ((), ())),
                                    preferred_element_type=jnp.float32)     # (S, S)
            s = s + mask2d
            s = s - jnp.max(s, axis=-1, keepdims=True)
            p = jnp.exp(s)
            p = p * pl.reciprocal(jnp.sum(p, axis=-1, keepdims=True), approx=True)
            ctx = jnp.dot(p.astype(jnp.bfloat16), v,
                          preferred_element_type=jnp.float32)               # (S, D_PAD)
            # accumulate output projection per head: no concat / lane repack
            attn = attn + _mm(ctx, wo_l[hh * D_PAD:(hh + 1) * D_PAD, :])

        h1 = _ln(attn + x, sag_ref[l], sab_ref[l])                          # (S, H)

        # TODO(synk): HF DistilBERT uses exact (erf) GELU; tanh approximation kept here.
        ff = jax.nn.gelu(_mm(h1, w1_ref[l], b1_ref[l]))                     # (S, FFN)
        x = _ln(_mm(ff, w2_ref[l], b2_ref[l]) + h1, og_ref[l], ob_ref[l])   # (S, H)

    # classifier head on hidden_states[-2]; run GEMMs over all S rows (MXU-
    # friendly M=8), keep only the CLS (row 0) result.
    pooled = jnp.maximum(_mm(x, prew_ref[...], preb_ref[...]), 0.0)         # ReLU
    # TODO(synk): Dropout(0.3) is identity at inference (eval mode); omitted.
    logits = _mm(pooled, clsw_ref[...], clsb_ref[...])                      # (S, CLS_PAD)
    out_ref[0] = logits[0:1, :].astype(out_ref.dtype)


# ---------------- wrapper ----------------
def forward(params, input_ids, attention_mask):
    B, S = input_ids.shape
    H = HIDDEN

    # embeddings (gathers are plain-JAX glue)
    we = params["word_emb"][input_ids]                       # (B, S, H)
    pe = params["pos_emb"][:S]                               # (S, H)
    emb = (we + pe[None]).astype(jnp.float32)                # (B, S, H)

    # additive attention mask, one row per batch element: (B, 1, S)
    mask_add = jnp.where(attention_mask[:, None, :] > 0, 0.0, -1e9).astype(jnp.float32)

    c2 = lambda b: (0, 0)        # resident 2-D weight blocks
    c3 = lambda b: (0, 0, 0)     # resident stacked (layer, ...) weight blocks

    logits_pad = pl.pallas_call(
        _forward_kernel,
        out_shape=jax.ShapeDtypeStruct((B, 1, CLS_PAD), jnp.float32),
        grid=(B,),
        in_specs=[
            pl.BlockSpec((1, S, H), lambda b: (b, 0, 0)),          # embeddings (one row)
            pl.BlockSpec((1, 1, S), lambda b: (b, 0, 0)),          # additive mask
            pl.BlockSpec((1, H), c2),                              # emb LN gamma
            pl.BlockSpec((1, H), c2),                              # emb LN beta
            pl.BlockSpec((N_USED, H, QKVP), c3),                   # wqkv (head-padded, resident)
            pl.BlockSpec((N_USED, 1, QKVP), c3),                   # bqkv
            pl.BlockSpec((N_USED, N_HEADS * D_PAD, H), c3),        # wo (row-padded)
            pl.BlockSpec((N_USED, 1, H), c3),                      # bo
            pl.BlockSpec((N_USED, 1, H), c3),                      # sa_ln gamma
            pl.BlockSpec((N_USED, 1, H), c3),                      # sa_ln beta
            pl.BlockSpec((N_USED, H, FFN), c3),                    # w1
            pl.BlockSpec((N_USED, 1, FFN), c3),                    # b1
            pl.BlockSpec((N_USED, FFN, H), c3),                    # w2
            pl.BlockSpec((N_USED, 1, H), c3),                      # b2
            pl.BlockSpec((N_USED, 1, H), c3),                      # out_ln gamma
            pl.BlockSpec((N_USED, 1, H), c3),                      # out_ln beta
            pl.BlockSpec((H, H), c2),                              # pre_classifier W
            pl.BlockSpec((1, H), c2),                              # pre_classifier b
            pl.BlockSpec((H, CLS_PAD), c2),                        # classifier W (lane-padded)
            pl.BlockSpec((1, CLS_PAD), c2),                        # classifier b (lane-padded)
        ],
        out_specs=pl.BlockSpec((1, 1, CLS_PAD), lambda b: (b, 0, 0)),
        compiler_params=pltpu.CompilerParams(
            dimension_semantics=("parallel",)),                    # megacore split on v7x
    )(emb, mask_add,
      params["emb_ln_g"], params["emb_ln_b"],
      params["wqkv"], params["bqkv"], params["wo"], params["bo"],
      params["sa_ln_g"], params["sa_ln_b"],
      params["w1"], params["b1"], params["w2"], params["b2"],
      params["out_ln_g"], params["out_ln_b"],
      params["pre_w"], params["pre_b"], params["cls_w_pad"], params["cls_b_pad"])

    return logits_pad[:, 0, :N_CLASSES]                            # (B, 2)


# ---------------- parameter init (deterministic, synthetic) ----------------
def _dense_init(key, k_in, k_out, scale=0.02):
    kw, kb = jax.random.split(key)
    w = scale * jax.random.normal(kw, (k_in, k_out), jnp.float32)
    b = scale * jax.random.normal(kb, (k_out,), jnp.float32)
    return w, b


def init_params(key):
    keys = jax.random.split(key, 4 + N_LAYERS)
    params = {
        "word_emb": 0.02 * jax.random.normal(keys[0], (VOCAB, HIDDEN), jnp.float32),
        "pos_emb": 0.02 * jax.random.normal(keys[1], (MAX_POS, HIDDEN), jnp.float32),
        "emb_ln_g": jnp.ones((1, HIDDEN), jnp.float32),
        "emb_ln_b": jnp.zeros((1, HIDDEN), jnp.float32),
    }
    attn_scale = 1.0 / (D_HEAD ** 0.5)
    wqkv_l, bqkv_l, wo_l, bo_l, w1_l, b1_l, w2_l, b2_l = ([] for _ in range(8))
    for i in range(N_LAYERS):
        lk = jax.random.split(keys[2 + i], 6)
        wq, bq = _dense_init(lk[0], HIDDEN, HIDDEN)
        wk, bk = _dense_init(lk[1], HIDDEN, HIDDEN)
        wv, bv = _dense_init(lk[2], HIDDEN, HIDDEN)
        wo, bo = _dense_init(lk[3], HIDDEN, HIDDEN)
        w1, b1 = _dense_init(lk[4], HIDDEN, FFN)
        w2, b2 = _dense_init(lk[5], FFN, HIDDEN)
        if i >= N_USED:
            continue  # hidden_states[-2]: the final encoder layer is never consumed

        # Fused Q|K|V GEMM, each head's D_HEAD columns zero-padded to a full
        # 128-lane tile so in-kernel head slices are lane-aligned (no relayout).
        # 1/sqrt(D_HEAD) folded into Q weights & bias.
        wqkv = jnp.zeros((HIDDEN, QKVP), jnp.float32)
        bqkv = jnp.zeros((QKVP,), jnp.float32)
        for hh in range(N_HEADS):
            cs, ce = hh * D_HEAD, (hh + 1) * D_HEAD
            qo = hh * D_PAD
            ko = N_HEADS * D_PAD + hh * D_PAD
            vo = 2 * N_HEADS * D_PAD + hh * D_PAD
            wqkv = wqkv.at[:, qo:qo + D_HEAD].set(wq[:, cs:ce] * attn_scale)
            bqkv = bqkv.at[qo:qo + D_HEAD].set(bq[cs:ce] * attn_scale)
            wqkv = wqkv.at[:, ko:ko + D_HEAD].set(wk[:, cs:ce])
            bqkv = bqkv.at[ko:ko + D_HEAD].set(bk[cs:ce])
            wqkv = wqkv.at[:, vo:vo + D_HEAD].set(wv[:, cs:ce])
            bqkv = bqkv.at[vo:vo + D_HEAD].set(bv[cs:ce])
        # Output projection with matching zero-padded rows per head.
        wop = jnp.zeros((N_HEADS * D_PAD, HIDDEN), jnp.float32)
        for hh in range(N_HEADS):
            wop = wop.at[hh * D_PAD:hh * D_PAD + D_HEAD, :].set(
                wo[hh * D_HEAD:(hh + 1) * D_HEAD, :])

        wqkv_l.append(wqkv.astype(jnp.bfloat16))
        bqkv_l.append(bqkv.reshape(1, QKVP))
        wo_l.append(wop.astype(jnp.bfloat16))
        bo_l.append(bo.reshape(1, HIDDEN))
        w1_l.append(w1.astype(jnp.bfloat16)); b1_l.append(b1.reshape(1, FFN))
        w2_l.append(w2.astype(jnp.bfloat16)); b2_l.append(b2.reshape(1, HIDDEN))

    params.update(
        wqkv=jnp.stack(wqkv_l), bqkv=jnp.stack(bqkv_l),
        wo=jnp.stack(wo_l), bo=jnp.stack(bo_l),
        sa_ln_g=jnp.ones((N_USED, 1, HIDDEN), jnp.float32),
        sa_ln_b=jnp.zeros((N_USED, 1, HIDDEN), jnp.float32),
        w1=jnp.stack(w1_l), b1=jnp.stack(b1_l),
        w2=jnp.stack(w2_l), b2=jnp.stack(b2_l),
        out_ln_g=jnp.ones((N_USED, 1, HIDDEN), jnp.float32),
        out_ln_b=jnp.zeros((N_USED, 1, HIDDEN), jnp.float32),
    )

    pre_w, pre_b = _dense_init(keys[2 + N_LAYERS], HIDDEN, HIDDEN)
    cls_w, cls_b = _dense_init(keys[3 + N_LAYERS], HIDDEN, N_CLASSES)
    # Lane-pad the 2-class classifier to 128 output columns (sliced in glue).
    cls_w_pad = jnp.zeros((HIDDEN, CLS_PAD), jnp.float32).at[:, :N_CLASSES].set(cls_w)
    cls_b_pad = jnp.zeros((1, CLS_PAD), jnp.float32).at[0, :N_CLASSES].set(cls_b)
    params.update(pre_w=pre_w.astype(jnp.bfloat16), pre_b=pre_b.reshape(1, HIDDEN),
                  cls_w_pad=cls_w_pad.astype(jnp.bfloat16), cls_b_pad=cls_b_pad)
    return params


# ---------------- main ----------------
if __name__ == "__main__":
    key = jax.random.PRNGKey(0)
    pkey, ikey = jax.random.split(key)
    params = init_params(pkey)

    B, S = 2, 8
    input_ids = jax.random.randint(ikey, (B, S), 0, VOCAB, dtype=jnp.int32)
    attention_mask = jnp.ones((B, S), jnp.int32).at[1, 6:].set(0)  # pad last 2 tokens of row 1

    logits = jax.jit(forward)(params, input_ids, attention_mask)
    logits = jax.block_until_ready(logits)
    assert logits.shape == (B, N_CLASSES)
    assert bool(jnp.all(jnp.isfinite(logits)))
    print("KERNEL_OK")
</pallas_src>

<mosaic_0001>
module attributes {stable_mosaic.version = 11 : i64} {
  func.func @_forward_kernel(%arg0: i32, %arg1: memref<1x8x128xf32, #tpu.memory_space<vmem>>, %arg2: memref<1x1x8xf32, #tpu.memory_space<vmem>>, %arg3: memref<1x128xf32, #tpu.memory_space<vmem>>, %arg4: memref<1x128xf32, #tpu.memory_space<vmem>>, %arg5: memref<1x128x768xbf16, #tpu.memory_space<vmem>>, %arg6: memref<1x1x768xf32, #tpu.memory_space<vmem>>, %arg7: memref<1x256x128xbf16, #tpu.memory_space<vmem>>, %arg8: memref<1x1x128xf32, #tpu.memory_space<vmem>>, %arg9: memref<1x1x128xf32, #tpu.memory_space<vmem>>, %arg10: memref<1x1x128xf32, #tpu.memory_space<vmem>>, %arg11: memref<1x128x256xbf16, #tpu.memory_space<vmem>>, %arg12: memref<1x1x256xf32, #tpu.memory_space<vmem>>, %arg13: memref<1x256x128xbf16, #tpu.memory_space<vmem>>, %arg14: memref<1x1x128xf32, #tpu.memory_space<vmem>>, %arg15: memref<1x1x128xf32, #tpu.memory_space<vmem>>, %arg16: memref<1x1x128xf32, #tpu.memory_space<vmem>>, %arg17: memref<128x128xbf16, #tpu.memory_space<vmem>>, %arg18: memref<1x128xf32, #tpu.memory_space<vmem>>, %arg19: memref<128x128xbf16, #tpu.memory_space<vmem>>, %arg20: memref<1x128xf32, #tpu.memory_space<vmem>>, %arg21: memref<1x1x128xf32, #tpu.memory_space<vmem>>) attributes {dimension_semantics = [#tpu.dimension_semantics<parallel>], iteration_bounds = array<i64: 2>, scalar_prefetch = 0 : i64, scratch_operands = 0 : i64, tpu.core_type = #tpu.core_type<tc>, window_params = [{transform_indices = @transform_0, window_bounds = array<i64: 1, 8, 128>}, {transform_indices = @transform_1, window_bounds = array<i64: 1, 1, 8>}, {pipeline_mode = #tpu.pipeline_mode<synchronous>, transform_indices = @transform_2, window_bounds = array<i64: 1, 128>}, {pipeline_mode = #tpu.pipeline_mode<synchronous>, transform_indices = @transform_3, window_bounds = array<i64: 1, 128>}, {pipeline_mode = #tpu.pipeline_mode<synchronous>, transform_indices = @transform_4, window_bounds = array<i64: 1, 128, 768>}, {pipeline_mode = #tpu.pipeline_mode<synchronous>, transform_indices = @transform_5, window_bounds = array<i64: 1, 1, 768>}, {pipeline_mode = #tpu.pipeline_mode<synchronous>, transform_indices = @transform_6, window_bounds = array<i64: 1, 256, 128>}, {pipeline_mode = #tpu.pipeline_mode<synchronous>, transform_indices = @transform_7, window_bounds = array<i64: 1, 1, 128>}, {pipeline_mode = #tpu.pipeline_mode<synchronous>, transform_indices = @transform_8, window_bounds = array<i64: 1, 1, 128>}, {pipeline_mode = #tpu.pipeline_mode<synchronous>, transform_indices = @transform_9, window_bounds = array<i64: 1, 1, 128>}, {pipeline_mode = #tpu.pipeline_mode<synchronous>, transform_indices = @transform_10, window_bounds = array<i64: 1, 128, 256>}, {pipeline_mode = #tpu.pipeline_mode<synchronous>, transform_indices = @transform_11, window_bounds = array<i64: 1, 1, 256>}, {pipeline_mode = #tpu.pipeline_mode<synchronous>, transform_indices = @transform_12, window_bounds = array<i64: 1, 256, 128>}, {pipeline_mode = #tpu.pipeline_mode<synchronous>, transform_indices = @transform_13, window_bounds = array<i64: 1, 1, 128>}, {pipeline_mode = #tpu.pipeline_mode<synchronous>, transform_indices = @transform_14, window_bounds = array<i64: 1, 1, 128>}, {pipeline_mode = #tpu.pipeline_mode<synchronous>, transform_indices = @transform_15, window_bounds = array<i64: 1, 1, 128>}, {pipeline_mode = #tpu.pipeline_mode<synchronous>, transform_indices = @transform_16, window_bounds = array<i64: 128, 128>}, {pipeline_mode = #tpu.pipeline_mode<synchronous>, transform_indices = @transform_17, window_bounds = array<i64: 1, 128>}, {pipeline_mode = #tpu.pipeline_mode<synchronous>, transform_indices = @transform_18, window_bounds = array<i64: 128, 128>}, {pipeline_mode = #tpu.pipeline_mode<synchronous>, transform_indices = @transform_19, window_bounds = array<i64: 1, 128>}, {transform_indices = @transform_20, window_bounds = array<i64: 1, 1, 128>}]} {
    %c0 = arith.constant 0 : index
    %c0_0 = arith.constant 0 : index
    %c0_1 = arith.constant 0 : index
    %0 = vector.load %arg1[%c0, %c0_0, %c0_1] : memref<1x8x128xf32, #tpu.memory_space<vmem>>, vector<1x8x128xf32>
    %1 = vector.shape_cast %0 : vector<1x8x128xf32> to vector<8x128xf32>
    %c0_2 = arith.constant 0 : index
    %c0_3 = arith.constant 0 : index
    %2 = vector.load %arg3[%c0_2, %c0_3] : memref<1x128xf32, #tpu.memory_space<vmem>>, vector<1x128xf32>
    %c0_4 = arith.constant 0 : index
    %c0_5 = arith.constant 0 : index
    %3 = vector.load %arg4[%c0_4, %c0_5] : memref<1x128xf32, #tpu.memory_space<vmem>>, vector<1x128xf32>
    %cst = arith.constant dense<0.000000e+00> : vector<8xf32>
    %4 = vector.multi_reduction <add>, %1, %cst [1] : vector<8x128xf32> to vector<8xf32>
    %5 = vector.shape_cast %4 : vector<8xf32> to vector<8x1xf32>
    %cst_6 = arith.constant 1.280000e+02 : f32
    %6 = vector.broadcast %cst_6 : f32 to vector<8x1xf32>
    %7 = arith.divf %5, %6 : vector<8x1xf32>
    %8 = vector.broadcast %7 : vector<8x1xf32> to vector<8x128xf32>
    %9 = arith.subf %1, %8 : vector<8x128xf32>
    %10 = arith.mulf %9, %9 : vector<8x128xf32>
    %cst_7 = arith.constant dense<0.000000e+00> : vector<8xf32>
    %11 = vector.multi_reduction <add>, %10, %cst_7 [1] : vector<8x128xf32> to vector<8xf32>
    %12 = vector.shape_cast %11 : vector<8xf32> to vector<8x1xf32>
    %cst_8 = arith.constant 1.280000e+02 : f32
    %13 = vector.broadcast %cst_8 : f32 to vector<8x1xf32>
    %14 = arith.divf %12, %13 : vector<8x1xf32>
    %15 = vector.broadcast %7 : vector<8x1xf32> to vector<8x128xf32>
    %16 = arith.subf %1, %15 : vector<8x128xf32>
    %cst_9 = arith.constant 9.99999996E-13 : f32
    %17 = vector.broadcast %cst_9 : f32 to vector<8x1xf32>
    %18 = arith.addf %14, %17 : vector<8x1xf32>
    %19 = math.rsqrt %18 : vector<8x1xf32>
    %20 = vector.broadcast %19 : vector<8x1xf32> to vector<8x128xf32>
    %21 = arith.mulf %16, %20 : vector<8x128xf32>
    %22 = vector.broadcast %2 : vector<1x128xf32> to vector<8x128xf32>
    %23 = arith.mulf %21, %22 : vector<8x128xf32>
    %24 = vector.broadcast %3 : vector<1x128xf32> to vector<8x128xf32>
    %25 = arith.addf %23, %24 : vector<8x128xf32>
    %c0_10 = arith.constant 0 : index
    %c0_11 = arith.constant 0 : index
    %c0_12 = arith.constant 0 : index
    %26 = vector.load %arg2[%c0_10, %c0_11, %c0_12] : memref<1x1x8xf32, #tpu.memory_space<vmem>>, vector<1x1x8xf32>
    %27 = vector.shape_cast %26 : vector<1x1x8xf32> to vector<1x8xf32>
    %28 = vector.shape_cast %27 : vector<1x8xf32> to vector<1x8xf32>
    %29 = vector.broadcast %28 : vector<1x8xf32> to vector<8x8xf32>
    %c0_13 = arith.constant 0 : index
    %c0_14 = arith.constant 0 : index
    %c0_15 = arith.constant 0 : index
    %30 = vector.load %arg5[%c0_13, %c0_14, %c0_15] : memref<1x128x768xbf16, #tpu.memory_space<vmem>>, vector<1x128x768xbf16>
    %31 = vector.shape_cast %30 : vector<1x128x768xbf16> to vector<128x768xbf16>
    %c0_16 = arith.constant 0 : index
    %c0_17 = arith.constant 0 : index
    %c0_18 = arith.constant 0 : index
    %32 = vector.load %arg6[%c0_16, %c0_17, %c0_18] : memref<1x1x768xf32, #tpu.memory_space<vmem>>, vector<1x1x768xf32>
    %33 = vector.shape_cast %32 : vector<1x1x768xf32> to vector<1x768xf32>
    %34 = arith.truncf %25 : vector<8x128xf32> to vector<8x128xbf16>
    %cst_19 = arith.constant dense<0.000000e+00> : vector<8x768xf32>
    %35 = tpu.matmul %34, %31, %cst_19 {dimension_numbers = #tpu.dot_dimension_numbers<[1], [0], [0], [1], [0, 0, 1, 1], [], []>} : vector<8x128xbf16>, vector<128x768xbf16>, vector<8x768xf32> -> vector<8x768xf32>
    %36 = vector.broadcast %33 : vector<1x768xf32> to vector<8x768xf32>
    %37 = arith.addf %35, %36 : vector<8x768xf32>
    %38 = arith.truncf %37 : vector<8x768xf32> to vector<8x768xbf16>
    %c0_20 = arith.constant 0 : index
    %c0_21 = arith.constant 0 : index
    %c0_22 = arith.constant 0 : index
    %39 = vector.load %arg7[%c0_20, %c0_21, %c0_22] : memref<1x256x128xbf16, #tpu.memory_space<vmem>>, vector<1x256x128xbf16>
    %40 = vector.shape_cast %39 : vector<1x256x128xbf16> to vector<256x128xbf16>
    %c0_23 = arith.constant 0 : index
    %c0_24 = arith.constant 0 : index
    %c0_25 = arith.constant 0 : index
    %41 = vector.load %arg8[%c0_23, %c0_24, %c0_25] : memref<1x1x128xf32, #tpu.memory_space<vmem>>, vector<1x1x128xf32>
    %42 = vector.shape_cast %41 : vector<1x1x128xf32> to vector<1x128xf32>
    %43 = vector.extract_strided_slice %38 {offsets = [0, 0], sizes = [8, 128], strides = [1, 1]} : vector<8x768xbf16> to vector<8x128xbf16>
    %44 = vector.extract_strided_slice %38 {offsets = [0, 256], sizes = [8, 128], strides = [1, 1]} : vector<8x768xbf16> to vector<8x128xbf16>
    %45 = vector.extract_strided_slice %38 {offsets = [0, 512], sizes = [8, 128], strides = [1, 1]} : vector<8x768xbf16> to vector<8x128xbf16>
    %cst_26 = arith.constant dense<0.000000e+00> : vector<8x8xf32>
    %46 = tpu.matmul %43, %44, %cst_26 {dimension_numbers = #tpu.dot_dimension_numbers<[1], [1], [0], [0], [0, 0, 1, 0], [], []>} : vector<8x128xbf16>, vector<8x128xbf16>, vector<8x8xf32> -> vector<8x8xf32>
    %47 = arith.addf %46, %29 : vector<8x8xf32>
    %cst_27 = arith.constant dense<0xFF800000> : vector<8xf32>
    %48 = vector.multi_reduction <maximumf>, %47, %cst_27 [1] : vector<8x8xf32> to vector<8xf32>
    %49 = vector.shape_cast %48 : vector<8xf32> to vector<8x1xf32>
    %50 = vector.broadcast %49 : vector<8x1xf32> to vector<8x8xf32>
    %51 = arith.subf %47, %50 : vector<8x8xf32>
    %52 = math.exp %51 : vector<8x8xf32>
    %cst_28 = arith.constant dense<0.000000e+00> : vector<8xf32>
    %53 = vector.multi_reduction <add>, %52, %cst_28 [1] : vector<8x8xf32> to vector<8xf32>
    %54 = vector.shape_cast %53 : vector<8xf32> to vector<8x1xf32>
    %55 = tpu.reciprocal %54 {approx = true} : vector<8x1xf32> -> vector<8x1xf32>
    %56 = vector.broadcast %55 : vector<8x1xf32> to vector<8x8xf32>
    %57 = arith.mulf %52, %56 : vector<8x8xf32>
    %58 = arith.truncf %57 : vector<8x8xf32> to vector<8x8xbf16>
    %cst_29 = arith.constant dense<0.000000e+00> : vector<8x128xf32>
    %59 = tpu.matmul %58, %45, %cst_29 {dimension_numbers = #tpu.dot_dimension_numbers<[1], [0], [0], [1], [0, 0, 1, 1], [], []>} : vector<8x8xbf16>, vector<8x128xbf16>, vector<8x128xf32> -> vector<8x128xf32>
    %60 = vector.extract_strided_slice %40 {offsets = [0, 0], sizes = [128, 128], strides = [1, 1]} : vector<256x128xbf16> to vector<128x128xbf16>
    %61 = arith.truncf %59 : vector<8x128xf32> to vector<8x128xbf16>
    %cst_30 = arith.constant dense<0.000000e+00> : vector<8x128xf32>
    %62 = tpu.matmul %61, %60, %cst_30 {dimension_numbers = #tpu.dot_dimension_numbers<[1], [0], [0], [1], [0, 0, 1, 1], [], []>} : vector<8x128xbf16>, vector<128x128xbf16>, vector<8x128xf32> -> vector<8x128xf32>
    %63 = vector.broadcast %42 : vector<1x128xf32> to vector<8x128xf32>
    %64 = arith.addf %63, %62 : vector<8x128xf32>
    %65 = vector.extract_strided_slice %38 {offsets = [0, 128], sizes = [8, 128], strides = [1, 1]} : vector<8x768xbf16> to vector<8x128xbf16>
    %66 = vector.extract_strided_slice %38 {offsets = [0, 384], sizes = [8, 128], strides = [1, 1]} : vector<8x768xbf16> to vector<8x128xbf16>
    %67 = vector.extract_strided_slice %38 {offsets = [0, 640], sizes = [8, 128], strides = [1, 1]} : vector<8x768xbf16> to vector<8x128xbf16>
    %cst_31 = arith.constant dense<0.000000e+00> : vector<8x8xf32>
    %68 = tpu.matmul %65, %66, %cst_31 {dimension_numbers = #tpu.dot_dimension_numbers<[1], [1], [0], [0], [0, 0, 1, 0], [], []>} : vector<8x128xbf16>, vector<8x128xbf16>, vector<8x8xf32> -> vector<8x8xf32>
    %69 = arith.addf %68, %29 : vector<8x8xf32>
    %cst_32 = arith.constant dense<0xFF800000> : vector<8xf32>
    %70 = vector.multi_reduction <maximumf>, %69, %cst_32 [1] : vector<8x8xf32> to vector<8xf32>
    %71 = vector.shape_cast %70 : vector<8xf32> to vector<8x1xf32>
    %72 = vector.broadcast %71 : vector<8x1xf32> to vector<8x8xf32>
    %73 = arith.subf %69, %72 : vector<8x8xf32>
    %74 = math.exp %73 : vector<8x8xf32>
    %cst_33 = arith.constant dense<0.000000e+00> : vector<8xf32>
    %75 = vector.multi_reduction <add>, %74, %cst_33 [1] : vector<8x8xf32> to vector<8xf32>
    %76 = vector.shape_cast %75 : vector<8xf32> to vector<8x1xf32>
    %77 = tpu.reciprocal %76 {approx = true} : vector<8x1xf32> -> vector<8x1xf32>
    %78 = vector.broadcast %77 : vector<8x1xf32> to vector<8x8xf32>
    %79 = arith.mulf %74, %78 : vector<8x8xf32>
    %80 = arith.truncf %79 : vector<8x8xf32> to vector<8x8xbf16>
    %cst_34 = arith.constant dense<0.000000e+00> : vector<8x128xf32>
    %81 = tpu.matmul %80, %67, %cst_34 {dimension_numbers = #tpu.dot_dimension_numbers<[1], [0], [0], [1], [0, 0, 1, 1], [], []>} : vector<8x8xbf16>, vector<8x128xbf16>, vector<8x128xf32> -> vector<8x128xf32>
    %82 = vector.extract_strided_slice %40 {offsets = [128, 0], sizes = [128, 128], strides = [1, 1]} : vector<256x128xbf16> to vector<128x128xbf16>
    %83 = arith.truncf %81 : vector<8x128xf32> to vector<8x128xbf16>
    %cst_35 = arith.constant dense<0.000000e+00> : vector<8x128xf32>
    %84 = tpu.matmul %83, %82, %cst_35 {dimension_numbers = #tpu.dot_dimension_numbers<[1], [0], [0], [1], [0, 0, 1, 1], [], []>} : vector<8x128xbf16>, vector<128x128xbf16>, vector<8x128xf32> -> vector<8x128xf32>
    %85 = arith.addf %64, %84 : vector<8x128xf32>
    %86 = arith.addf %85, %25 : vector<8x128xf32>
    %c0_36 = arith.constant 0 : index
    %c0_37 = arith.constant 0 : index
    %c0_38 = arith.constant 0 : index
    %87 = vector.load %arg9[%c0_36, %c0_37, %c0_38] : memref<1x1x128xf32, #tpu.memory_space<vmem>>, vector<1x1x128xf32>
    %88 = vector.shape_cast %87 : vector<1x1x128xf32> to vector<1x128xf32>
    %c0_39 = arith.constant 0 : index
    %c0_40 = arith.constant 0 : index
    %c0_41 = arith.constant 0 : index
    %89 = vector.load %arg10[%c0_39, %c0_40, %c0_41] : memref<1x1x128xf32, #tpu.memory_space<vmem>>, vector<1x1x128xf32>
    %90 = vector.shape_cast %89 : vector<1x1x128xf32> to vector<1x128xf32>
    %cst_42 = arith.constant dense<0.000000e+00> : vector<8xf32>
    %91 = vector.multi_reduction <add>, %86, %cst_42 [1] : vector<8x128xf32> to vector<8xf32>
    %92 = vector.shape_cast %91 : vector<8xf32> to vector<8x1xf32>
    %cst_43 = arith.constant 1.280000e+02 : f32
    %93 = vector.broadcast %cst_43 : f32 to vector<8x1xf32>
    %94 = arith.divf %92, %93 : vector<8x1xf32>
    %95 = vector.broadcast %94 : vector<8x1xf32> to vector<8x128xf32>
    %96 = arith.subf %86, %95 : vector<8x128xf32>
    %97 = arith.mulf %96, %96 : vector<8x128xf32>
    %cst_44 = arith.constant dense<0.000000e+00> : vector<8xf32>
    %98 = vector.multi_reduction <add>, %97, %cst_44 [1] : vector<8x128xf32> to vector<8xf32>
    %99 = vector.shape_cast %98 : vector<8xf32> to vector<8x1xf32>
    %cst_45 = arith.constant 1.280000e+02 : f32
    %100 = vector.broadcast %cst_45 : f32 to vector<8x1xf32>
    %101 = arith.divf %99, %100 : vector<8x1xf32>
    %102 = vector.broadcast %94 : vector<8x1xf32> to vector<8x128xf32>
    %103 = arith.subf %86, %102 : vector<8x128xf32>
    %cst_46 = arith.constant 9.99999996E-13 : f32
    %104 = vector.broadcast %cst_46 : f32 to vector<8x1xf32>
    %105 = arith.addf %101, %104 : vector<8x1xf32>
    %106 = math.rsqrt %105 : vector<8x1xf32>
    %107 = vector.broadcast %106 : vector<8x1xf32> to vector<8x128xf32>
    %108 = arith.mulf %103, %107 : vector<8x128xf32>
    %109 = vector.broadcast %88 : vector<1x128xf32> to vector<8x128xf32>
    %110 = arith.mulf %108, %109 : vector<8x128xf32>
    %111 = vector.broadcast %90 : vector<1x128xf32> to vector<8x128xf32>
    %112 = arith.addf %110, %111 : vector<8x128xf32>
    %c0_47 = arith.constant 0 : index
    %c0_48 = arith.constant 0 : index
    %c0_49 = arith.constant 0 : index
    %113 = vector.load %arg11[%c0_47, %c0_48, %c0_49] : memref<1x128x256xbf16, #tpu.memory_space<vmem>>, vector<1x128x256xbf16>
    %114 = vector.shape_cast %113 : vector<1x128x256xbf16> to vector<128x256xbf16>
    %c0_50 = arith.constant 0 : index
    %c0_51 = arith.constant 0 : index
    %c0_52 = arith.constant 0 : index
    %115 = vector.load %arg12[%c0_50, %c0_51, %c0_52] : memref<1x1x256xf32, #tpu.memory_space<vmem>>, vector<1x1x256xf32>
    %116 = vector.shape_cast %115 : vector<1x1x256xf32> to vector<1x256xf32>
    %117 = arith.truncf %112 : vector<8x128xf32> to vector<8x128xbf16>
    %cst_53 = arith.constant dense<0.000000e+00> : vector<8x256xf32>
    %118 = tpu.matmul %117, %114, %cst_53 {dimension_numbers = #tpu.dot_dimension_numbers<[1], [0], [0], [1], [0, 0, 1, 1], [], []>} : vector<8x128xbf16>, vector<128x256xbf16>, vector<8x256xf32> -> vector<8x256xf32>
    %119 = vector.broadcast %116 : vector<1x256xf32> to vector<8x256xf32>
    %120 = arith.addf %118, %119 : vector<8x256xf32>
    %121 = arith.mulf %120, %120 : vector<8x256xf32>
    %122 = arith.mulf %120, %121 : vector<8x256xf32>
    %cst_54 = arith.constant 4.471500e-02 : f32
    %123 = vector.broadcast %cst_54 : f32 to vector<8x256xf32>
    %124 = arith.mulf %123, %122 : vector<8x256xf32>
    %125 = arith.addf %120, %124 : vector<8x256xf32>
    %cst_55 = arith.constant 0.797884583 : f32
    %126 = vector.broadcast %cst_55 : f32 to vector<8x256xf32>
    %127 = arith.mulf %126, %125 : vector<8x256xf32>
    %128 = math.tanh %127 : vector<8x256xf32>
    %cst_56 = arith.constant 1.000000e+00 : f32
    %129 = vector.broadcast %cst_56 : f32 to vector<8x256xf32>
    %130 = arith.addf %129, %128 : vector<8x256xf32>
    %cst_57 = arith.constant 5.000000e-01 : f32
    %131 = vector.broadcast %cst_57 : f32 to vector<8x256xf32>
    %132 = arith.mulf %131, %130 : vector<8x256xf32>
    %133 = arith.mulf %120, %132 : vector<8x256xf32>
    %c0_58 = arith.constant 0 : index
    %c0_59 = arith.constant 0 : index
    %c0_60 = arith.constant 0 : index
    %134 = vector.load %arg13[%c0_58, %c0_59, %c0_60] : memref<1x256x128xbf16, #tpu.memory_space<vmem>>, vector<1x256x128xbf16>
    %135 = vector.shape_cast %134 : vector<1x256x128xbf16> to vector<256x128xbf16>
    %c0_61 = arith.constant 0 : index
    %c0_62 = arith.constant 0 : index
    %c0_63 = arith.constant 0 : index
    %136 = vector.load %arg14[%c0_61, %c0_62, %c0_63] : memref<1x1x128xf32, #tpu.memory_space<vmem>>, vector<1x1x128xf32>
    %137 = vector.shape_cast %136 : vector<1x1x128xf32> to vector<1x128xf32>
    %138 = arith.truncf %133 : vector<8x256xf32> to vector<8x256xbf16>
    %cst_64 = arith.constant dense<0.000000e+00> : vector<8x128xf32>
    %139 = tpu.matmul %138, %135, %cst_64 {dimension_numbers = #tpu.dot_dimension_numbers<[1], [0], [0], [1], [0, 0, 1, 1], [], []>} : vector<8x256xbf16>, vector<256x128xbf16>, vector<8x128xf32> -> vector<8x128xf32>
    %140 = vector.broadcast %137 : vector<1x128xf32> to vector<8x128xf32>
    %141 = arith.addf %139, %140 : vector<8x128xf32>
    %142 = arith.addf %141, %112 : vector<8x128xf32>
    %c0_65 = arith.constant 0 : index
    %c0_66 = arith.constant 0 : index
    %c0_67 = arith.constant 0 : index
    %143 = vector.load %arg15[%c0_65, %c0_66, %c0_67] : memref<1x1x128xf32, #tpu.memory_space<vmem>>, vector<1x1x128xf32>
    %144 = vector.shape_cast %143 : vector<1x1x128xf32> to vector<1x128xf32>
    %c0_68 = arith.constant 0 : index
    %c0_69 = arith.constant 0 : index
    %c0_70 = arith.constant 0 : index
    %145 = vector.load %arg16[%c0_68, %c0_69, %c0_70] : memref<1x1x128xf32, #tpu.memory_space<vmem>>, vector<1x1x128xf32>
    %146 = vector.shape_cast %145 : vector<1x1x128xf32> to vector<1x128xf32>
    %cst_71 = arith.constant dense<0.000000e+00> : vector<8xf32>
    %147 = vector.multi_reduction <add>, %142, %cst_71 [1] : vector<8x128xf32> to vector<8xf32>
    %148 = vector.shape_cast %147 : vector<8xf32> to vector<8x1xf32>
    %cst_72 = arith.constant 1.280000e+02 : f32
    %149 = vector.broadcast %cst_72 : f32 to vector<8x1xf32>
    %150 = arith.divf %148, %149 : vector<8x1xf32>
    %151 = vector.broadcast %150 : vector<8x1xf32> to vector<8x128xf32>
    %152 = arith.subf %142, %151 : vector<8x128xf32>
    %153 = arith.mulf %152, %152 : vector<8x128xf32>
    %cst_73 = arith.constant dense<0.000000e+00> : vector<8xf32>
    %154 = vector.multi_reduction <add>, %153, %cst_73 [1] : vector<8x128xf32> to vector<8xf32>
    %155 = vector.shape_cast %154 : vector<8xf32> to vector<8x1xf32>
    %cst_74 = arith.constant 1.280000e+02 : f32
    %156 = vector.broadcast %cst_74 : f32 to vector<8x1xf32>
    %157 = arith.divf %155, %156 : vector<8x1xf32>
    %158 = vector.broadcast %150 : vector<8x1xf32> to vector<8x128xf32>
    %159 = arith.subf %142, %158 : vector<8x128xf32>
    %cst_75 = arith.constant 9.99999996E-13 : f32
    %160 = vector.broadcast %cst_75 : f32 to vector<8x1xf32>
    %161 = arith.addf %157, %160 : vector<8x1xf32>
    %162 = math.rsqrt %161 : vector<8x1xf32>
    %163 = vector.broadcast %162 : vector<8x1xf32> to vector<8x128xf32>
    %164 = arith.mulf %159, %163 : vector<8x128xf32>
    %165 = vector.broadcast %144 : vector<1x128xf32> to vector<8x128xf32>
    %166 = arith.mulf %164, %165 : vector<8x128xf32>
    %167 = vector.broadcast %146 : vector<1x128xf32> to vector<8x128xf32>
    %168 = arith.addf %166, %167 : vector<8x128xf32>
    %c0_76 = arith.constant 0 : index
    %c0_77 = arith.constant 0 : index
    %169 = vector.load %arg17[%c0_76, %c0_77] : memref<128x128xbf16, #tpu.memory_space<vmem>>, vector<128x128xbf16>
    %c0_78 = arith.constant 0 : index
    %c0_79 = arith.constant 0 : index
    %170 = vector.load %arg18[%c0_78, %c0_79] : memref<1x128xf32, #tpu.memory_space<vmem>>, vector<1x128xf32>
    %171 = arith.truncf %168 : vector<8x128xf32> to vector<8x128xbf16>
    %cst_80 = arith.constant dense<0.000000e+00> : vector<8x128xf32>
    %172 = tpu.matmul %171, %169, %cst_80 {dimension_numbers = #tpu.dot_dimension_numbers<[1], [0], [0], [1], [0, 0, 1, 1], [], []>} : vector<8x128xbf16>, vector<128x128xbf16>, vector<8x128xf32> -> vector<8x128xf32>
    %173 = vector.broadcast %170 : vector<1x128xf32> to vector<8x128xf32>
    %174 = arith.addf %172, %173 : vector<8x128xf32>
    %cst_81 = arith.constant 0.000000e+00 : f32
    %175 = vector.broadcast %cst_81 : f32 to vector<8x128xf32>
    %176 = arith.maximumf %174, %175 : vector<8x128xf32>
    %c0_82 = arith.constant 0 : index
    %c0_83 = arith.constant 0 : index
    %177 = vector.load %arg19[%c0_82, %c0_83] : memref<128x128xbf16, #tpu.memory_space<vmem>>, vector<128x128xbf16>
    %c0_84 = arith.constant 0 : index
    %c0_85 = arith.constant 0 : index
    %178 = vector.load %arg20[%c0_84, %c0_85] : memref<1x128xf32, #tpu.memory_space<vmem>>, vector<1x128xf32>
    %179 = arith.truncf %176 : vector<8x128xf32> to vector<8x128xbf16>
    %cst_86 = arith.constant dense<0.000000e+00> : vector<8x128xf32>
    %180 = tpu.matmul %179, %177, %cst_86 {dimension_numbers = #tpu.dot_dimension_numbers<[1], [0], [0], [1], [0, 0, 1, 1], [], []>} : vector<8x128xbf16>, vector<128x128xbf16>, vector<8x128xf32> -> vector<8x128xf32>
    %181 = vector.broadcast %178 : vector<1x128xf32> to vector<8x128xf32>
    %182 = arith.addf %180, %181 : vector<8x128xf32>
    %183 = vector.extract_strided_slice %182 {offsets = [0, 0], sizes = [1, 128], strides = [1, 1]} : vector<8x128xf32> to vector<1x128xf32>
    %c0_87 = arith.constant 0 : index
    %c0_88 = arith.constant 0 : index
    %c0_89 = arith.constant 0 : index
    %184 = vector.load %arg21[%c0_87, %c0_88, %c0_89] : memref<1x1x128xf32, #tpu.memory_space<vmem>>, vector<1x1x128xf32>
    %185 = vector.shape_cast %184 : vector<1x1x128xf32> to vector<1x128xf32>
    %186 = vector.shape_cast %183 : vector<1x128xf32> to vector<1x1x128xf32>
    tpu.vector_store %arg21[%c0_87, %c0_88, %c0_89], %186 {strides = array<i32>} : memref<1x1x128xf32, #tpu.memory_space<vmem>>, vector<1x1x128xf32>,
    return
  }
  func.func @transform_0(%arg0: i32) -> (i32, i32, i32) {
    %c0_i32 = arith.constant 0 : i32
    %c0_i32_0 = arith.constant 0 : i32
    %c0_i32_1 = arith.constant 0 : i32
    return %arg0, %c0_i32, %c0_i32_0 : i32, i32, i32
  }
  func.func @transform_1(%arg0: i32) -> (i32, i32, i32) {
    %c0_i32 = arith.constant 0 : i32
    %c0_i32_0 = arith.constant 0 : i32
    %c0_i32_1 = arith.constant 0 : i32
    return %arg0, %c0_i32, %c0_i32_0 : i32, i32, i32
  }
  func.func @transform_2(%arg0: i32) -> (i32, i32) {
    %c0_i32 = arith.constant 0 : i32
    %c0_i32_0 = arith.constant 0 : i32
    %c0_i32_1 = arith.constant 0 : i32
    return %c0_i32, %c0_i32_0 : i32, i32
  }
  func.func @transform_3(%arg0: i32) -> (i32, i32) {
    %c0_i32 = arith.constant 0 : i32
    %c0_i32_0 = arith.constant 0 : i32
    %c0_i32_1 = arith.constant 0 : i32
    return %c0_i32, %c0_i32_0 : i32, i32
  }
  func.func @transform_4(%arg0: i32) -> (i32, i32, i32) {
    %c0_i32 = arith.constant 0 : i32
    %c0_i32_0 = arith.constant 0 : i32
    %c0_i32_1 = arith.constant 0 : i32
    %c0_i32_2 = arith.constant 0 : i32
    return %c0_i32, %c0_i32_0, %c0_i32_1 : i32, i32, i32
  }
  func.func @transform_5(%arg0: i32) -> (i32, i32, i32) {
    %c0_i32 = arith.constant 0 : i32
    %c0_i32_0 = arith.constant 0 : i32
    %c0_i32_1 = arith.constant 0 : i32
    %c0_i32_2 = arith.constant 0 : i32
    return %c0_i32, %c0_i32_0, %c0_i32_1 : i32, i32, i32
  }
  func.func @transform_6(%arg0: i32) -> (i32, i32, i32) {
    %c0_i32 = arith.constant 0 : i32
    %c0_i32_0 = arith.constant 0 : i32
    %c0_i32_1 = arith.constant 0 : i32
    %c0_i32_2 = arith.constant 0 : i32
    return %c0_i32, %c0_i32_0, %c0_i32_1 : i32, i32, i32
  }
  func.func @transform_7(%arg0: i32) -> (i32, i32, i32) {
    %c0_i32 = arith.constant 0 : i32
    %c0_i32_0 = arith.constant 0 : i32
    %c0_i32_1 = arith.constant 0 : i32
    %c0_i32_2 = arith.constant 0 : i32
    return %c0_i32, %c0_i32_0, %c0_i32_1 : i32, i32, i32
  }
  func.func @transform_8(%arg0: i32) -> (i32, i32, i32) {
    %c0_i32 = arith.constant 0 : i32
    %c0_i32_0 = arith.constant 0 : i32
    %c0_i32_1 = arith.constant 0 : i32
    %c0_i32_2 = arith.constant 0 : i32
    return %c0_i32, %c0_i32_0, %c0_i32_1 : i32, i32, i32
  }
  func.func @transform_9(%arg0: i32) -> (i32, i32, i32) {
    %c0_i32 = arith.constant 0 : i32
    %c0_i32_0 = arith.constant 0 : i32
    %c0_i32_1 = arith.constant 0 : i32
    %c0_i32_2 = arith.constant 0 : i32
    return %c0_i32, %c0_i32_0, %c0_i32_1 : i32, i32, i32
  }
  func.func @transform_10(%arg0: i32) -> (i32, i32, i32) {
    %c0_i32 = arith.constant 0 : i32
    %c0_i32_0 = arith.constant 0 : i32
    %c0_i32_1 = arith.constant 0 : i32
    %c0_i32_2 = arith.constant 0 : i32
    return %c0_i32, %c0_i32_0, %c0_i32_1 : i32, i32, i32
  }
  func.func @transform_11(%arg0: i32) -> (i32, i32, i32) {
    %c0_i32 = arith.constant 0 : i32
    %c0_i32_0 = arith.constant 0 : i32
    %c0_i32_1 = arith.constant 0 : i32
    %c0_i32_2 = arith.constant 0 : i32
    return %c0_i32, %c0_i32_0, %c0_i32_1 : i32, i32, i32
  }
  func.func @transform_12(%arg0: i32) -> (i32, i32, i32) {
    %c0_i32 = arith.constant 0 : i32
    %c0_i32_0 = arith.constant 0 : i32
    %c0_i32_1 = arith.constant 0 : i32
    %c0_i32_2 = arith.constant 0 : i32
    return %c0_i32, %c0_i32_0, %c0_i32_1 : i32, i32, i32
  }
  func.func @transform_13(%arg0: i32) -> (i32, i32, i32) {
    %c0_i32 = arith.constant 0 : i32
    %c0_i32_0 = arith.constant 0 : i32
    %c0_i32_1 = arith.constant 0 : i32
    %c0_i32_2 = arith.constant 0 : i32
    return %c0_i32, %c0_i32_0, %c0_i32_1 : i32, i32, i32
  }
  func.func @transform_14(%arg0: i32) -> (i32, i32, i32) {
    %c0_i32 = arith.constant 0 : i32
    %c0_i32_0 = arith.constant 0 : i32
    %c0_i32_1 = arith.constant 0 : i32
    %c0_i32_2 = arith.constant 0 : i32
    return %c0_i32, %c0_i32_0, %c0_i32_1 : i32, i32, i32
  }
  func.func @transform_15(%arg0: i32) -> (i32, i32, i32) {
    %c0_i32 = arith.constant 0 : i32
    %c0_i32_0 = arith.constant 0 : i32
    %c0_i32_1 = arith.constant 0 : i32
    %c0_i32_2 = arith.constant 0 : i32
    return %c0_i32, %c0_i32_0, %c0_i32_1 : i32, i32, i32
  }
  func.func @transform_16(%arg0: i32) -> (i32, i32) {
    %c0_i32 = arith.constant 0 : i32
    %c0_i32_0 = arith.constant 0 : i32
    %c0_i32_1 = arith.constant 0 : i32
    return %c0_i32, %c0_i32_0 : i32, i32
  }
  func.func @transform_17(%arg0: i32) -> (i32, i32) {
    %c0_i32 = arith.constant 0 : i32
    %c0_i32_0 = arith.constant 0 : i32
    %c0_i32_1 = arith.constant 0 : i32
    return %c0_i32, %c0_i32_0 : i32, i32
  }
  func.func @transform_18(%arg0: i32) -> (i32, i32) {
    %c0_i32 = arith.constant 0 : i32
    %c0_i32_0 = arith.constant 0 : i32
    %c0_i32_1 = arith.constant 0 : i32
    return %c0_i32, %c0_i32_0 : i32, i32
  }
  func.func @transform_19(%arg0: i32) -> (i32, i32) {
    %c0_i32 = arith.constant 0 : i32
    %c0_i32_0 = arith.constant 0 : i32
    %c0_i32_1 = arith.constant 0 : i32
    return %c0_i32, %c0_i32_0 : i32, i32
  }
  func.func @transform_20(%arg0: i32) -> (i32, i32, i32) {
    %c0_i32 = arith.constant 0 : i32
    %c0_i32_0 = arith.constant 0 : i32
    %c0_i32_1 = arith.constant 0 : i32
    return %arg0, %c0_i32, %c0_i32_0 : i32, i32, i32
  }
}

</mosaic_0001>

<bundles_post_ra>
// kernel: forward.1
= control target key start
LH: loop header
LB: loop body
LE: loop exit
PB: predicated region body
PF: predicated region fallthrough
CT: control target
= control target key end

     0   :  { %s4173_s0 = inlined_call_operand.vmem [shape: f32[2,8,128], index: 0, kind: input, shape index: {}]   ;;  %s4174_s1 = inlined_call_operand.vmem [shape: f32[2,1,8], index: 1, kind: input, shape index: {}]   ;;  %s4175_s2 = inlined_call_operand.hbm [shape: f32[1,128], index: 2, kind: input, shape index: {}]   ;;  %s4176_s3 = inlined_call_operand.vmem [shape: f32[1,128], index: 3, kind: input, shape index: {}]   ;;  %s4177_s4 = inlined_call_operand.hbm [shape: bf16[1,128,768], index: 4, kind: input, shape index: {}]   ;;  %s4178_s5 = inlined_call_operand.vmem [shape: f32[1,1,768], index: 5, kind: input, shape index: {}]   ;;  %s4179_s6 = inlined_call_operand.vmem [shape: bf16[1,256,128], index: 6, kind: input, shape index: {}]   ;;  %s4180_s7 = inlined_call_operand.vmem [shape: f32[1,1,128], index: 7, kind: input, shape index: {}]   ;;  %s4181_s8 = inlined_call_operand.hbm [shape: f32[1,1,128], index: 8, kind: input, shape index: {}]   ;;  %s4182_s9 = inlined_call_operand.hbm [shape: f32[1,1,128], index: 9, kind: input, shape index: {}]   ;;  %s4183_s10 = inlined_call_operand.hbm [shape: bf16[1,128,256], index: 10, kind: input, shape index: {}]   ;;  %s4184_s11 = inlined_call_operand.vmem [shape: f32[1,1,256], index: 11, kind: input, shape index: {}]   ;;  %s4185_s12 = inlined_call_operand.hbm [shape: bf16[1,256,128], index: 12, kind: input, shape index: {}]   ;;  %s4186_s13 = inlined_call_operand.vmem [shape: f32[1,1,128], index: 13, kind: input, shape index: {}]   ;;  %s4187_s14 = inlined_call_operand.hbm [shape: f32[1,1,128], index: 14, kind: input, shape index: {}]   ;;  %s4188_s15 = inlined_call_operand.hbm [shape: f32[1,1,128], index: 15, kind: input, shape index: {}]   ;;  %s4189_s16 = inlined_call_operand.vmem [shape: bf16[128,128], index: 16, kind: input, shape index: {}]   ;;  %s4190_s17 = inlined_call_operand.hbm [shape: f32[1,128], index: 17, kind: input, shape index: {}]   ;;  %s4191_s18 = inlined_call_operand.vmem [shape: bf16[128,128], index: 18, kind: input, shape index: {}]   ;;  %s4192_s19 = inlined_call_operand.hbm [shape: f32[1,128], index: 19, kind: input, shape index: {}]   ;;  %s4193_s20 = inlined_call_operand.hbm [shape: f32[2,1,128], index: 20, kind: output, shape index: {}]  }
   0x1   :  { %4212 = sst [smem:[#allocation35_spill]] %s4173_s0 }
   0x2   :  { %4213 = sst [smem:[#allocation36_spill]] %s4174_s1 }
   0x3   :  { %4214 = sst [smem:[#allocation37_spill]] %s4175_s2 }
   0x4   :  { %4215 = sst [smem:[#allocation38_spill]] %s4176_s3 }
   0x5   :  { %4216 = sst [smem:[#allocation39_spill]] %s4177_s4 }
   0x6   :  { %4217 = sst [smem:[#allocation40_spill]] %s4181_s8 }
   0x7   :  { %4218 = sst [smem:[#allocation41_spill]] %s4182_s9 }
   0x8   :  { %4219 = sst [smem:[#allocation42_spill]] %s4186_s13 }
   0x9   :  { %4220 = sst [smem:[#allocation43_spill]] %s4189_s16 }
   0xa   :  { %4221 = sst [smem:[#allocation44_spill]] %s4191_s18 }
   0xb   :  { %4222 = sst [smem:[#allocation45_spill]] %s4193_s20 }
   0xc   :  { %25 = vsyncpa [#allocation3], 0 }
   0xd   :  { %26 = vsyncpa [#allocation6], 0 }
   0xe   :  { %27 = vsyncpa [#allocation9], 0 }
   0xf   :  { %28 = vsyncpa [#allocation12], 0 }
  0x10   :  { %29 = vsyncpa [#allocation15], 0 }
  0x11   :  { %30 = vsyncpa [#allocation18], 0 }
  0x12   :  { %31 = vsyncpa [#allocation4], 0 }
  0x13   :  { %33 = vsyncpa [#allocation4 + $0x1], 0  ;;  %s3603_s1 = smov 0   ;;  %s3605_s22 = smov 0  }
  0x14   :  { %s3607_s23 = smov 0   ;;  %s3609_s24 = smov 0  }
  0x15 LB: > { %4223 = sst [smem:[#allocation27_spill]] %s3464_s1  ;;  %s3624_s2 = sadd.s32 4294967295, %s3476_s24   ;;  %s3476_s24 = sphi %s3609_s24, %s4267_s24   ;;  %s3472_s23 = sphi %s3607_s23, %s4270_s23   ;;  %s3468_s22 = sphi %s3605_s22, %s4269_s22   ;;  %s3464_s1 = sphi %s3603_s1, %s4268_s1  }
  0x16   : > { %4224 = sst [smem:[#allocation28_spill]] %s3468_s22  ;;  %s2476_s25 = sadd.s32 4294967294, %s3476_s24  }
  0x17   : > { %4225 = sst [smem:[#allocation29_spill]] %s3472_s23  ;;  %s3628_s3 = sadd.s32 1, %s3476_s24  }
  0x18   : > { %4226 = sst [smem:[#allocation30_spill]] %s3476_s24  ;;  %s476_s26 = sadd.s32 1, %s3472_s23 }
  0x19   : > { %4227 = sst [smem:[#allocation31_spill]] %s3628_s3  ;;  %s473_s27 = ssub.s32 %s3476_s24, %s3628_s3 }
  0x1a   : > { %p486_p0 = scmp.ne.s32.totalorder %s3472_s23, %s3468_s22  ;;  %p474_p1 = scmp.eq.s32.totalorder %s473_s27, 0 }
  0x1b   : > { %p487_p2 = scmp.eq.s32.totalorder %s3624_s2, 1  ;;  %p492_p3 = scmp.ne.s32.totalorder %s3468_s22, %s3464_s1 }
  0x1c   : > { %p493_p4 = scmp.eq.s32.totalorder %s2476_s25, 1  ;;  %p2477_p7 = scmp.ge.s32.totalorder %s3476_s24, 1 }
  0x1d   : > { %s3639_s28 = scalar_select %p474_p1, %s3472_s23, %s476_s26  }
  0x1e   : > { %p3641_p5 = por %p487_p2, %p486_p0  ;;  %p3645_p6 = por %p493_p4, %p492_p3 }
  0x1f   : > { %4228 = sst [smem:[#allocation32_spill]] %s3639_s28  ;;  %p500_p8 = scmp.lt.s32.totalorder %s3476_s24, 3 }
  0x20   : > { %s4229_s4 = scalar_select %p3641_p5, 1, 0 }
  0x21   : > { %s4231_s29 = scalar_select %p3645_p6, 1, 0 }
  0x22   : > { %4230 = sst [smem:[#allocation33_spill]] %s4229_s4  ;;  %p4205_p9 = scmp.eq.s32.totalorder %s3624_s2, 0 }
  0x23   : > { %4232 = sst [smem:[#allocation34_spill]] %s4231_s29  ;;  %p3652_p10 = pnand %p2477_p7, %p500_p8 }
  0x24   : > { %s3478_s0 = smov [#allocation5]   ;;  %s3479_s26 = smov [#allocation8]  }
  0x25   : > { %s4233_s30 = scalar_select %p3652_p10, 1, 0 }
  0x26   : > { %s526_s21 = sshll.u32 %s3478_s0, 4  ;;  %p2841_p11 = pneg %p3652_p10  ;;  %s3658_s21 = int_to_ptr.vmem [resolvable:$true] %s526_s21 }
  0x27   : > { %s560_s27 = sshll.u32 %s3479_s26, 4  ;;  %s3480_s28 = smov [#allocation11]   ;;  %s3666_s27 = int_to_ptr.vmem [resolvable:$true] %s560_s27 }
  0x28   : > { %p3662_p12 = pnand %p4205_p9, %p2841_p11  ;;  %s3668_s23 = sshll.u32 %s3480_s28, 4  ;;  %s587_s23 = int_to_ptr.vmem [resolvable:$true] %s3668_s23 }
  0x29   : > { %s4235_s0 = sld [smem:[#allocation39_spill]] }
  0x2a   : > { %p3678_p0 = pneg %p3662_p12 }
  0x2f   : > { %s3110_s1 = scalar_lea.hbm %s4235_s0, 6144 }
  0x30   : > { %p3111_p13 = scmp.ne.s32.totalorder %s4235_s0, %s3110_s1  ;;  %p3117_p3 = scmp.lt.u32.totalorder %s3110_s1, %s4235_s0 }
  0x32   : > { %p3113_p1 = pnand %p3678_p0, %p3111_p13 }
  0x34   : > { %p3114_p2 = pneg %p3113_p1 }
  0x36   : > { %p3119_p4 = pnand %p3117_p3, %p3114_p2 }
  0x38   : > { %3122 = shalt.err (!%p3119_p4)
}
  0x39   : > { %s3123_s20 = scalar_lea.vmem %s3658_s21, 6144  ;;  %p3131_p9 = scmp.lt.s32.totalorder %s3658_s21, %s3658_s21 }
  0x3a   : > { %p3124_p7 = scmp.ne.s32.totalorder %s3658_s21, %s3123_s20  ;;  %p3132_p6 = scmp.lt.s32.totalorder %s3123_s20, %s3123_s20 }
  0x3c   : > { %p3126_p8 = pnand %p3124_p7, %p3678_p0  ;;  %p3133_p13 = por %p3132_p6, %p3131_p9 }
  0x3e   : > { %p3127_p11 = pneg %p3126_p8 }
  0x40   : > { %p3134_p1 = pnand %p3133_p13, %p3127_p11 }
  0x42   : > { %3137 = shalt.err (!%p3134_p1)
}
  0x43   : > { %s3481_s24 = smov 384   ;;  %s3482_s1 = smov 24  }
  0x44   : > { %2847 = dma.hbm_to_vmem [thread:$0]  (!%p3662_p12), %s4235_s0, 6144, %s3658_s21, [#allocation6], %s3481_s24, %s3481_s24, %s3482_s1  }
  0x45   : > { %s4237_s9 = sld [smem:[#allocation41_spill]] }
  0x4b   : > { %s3138_s22 = scalar_lea.hbm %s4237_s9, 16 }
  0x4c   : > { %p3139_p6 = scmp.ne.s32.totalorder %s4237_s9, %s3138_s22  ;;  %p3145_p3 = scmp.lt.u32.totalorder %s3138_s22, %s4237_s9 }
  0x4e   : > { %p3141_p9 = pnand %p3139_p6, %p3678_p0 }
  0x50   : > { %p3142_p2 = pneg %p3141_p9 }
  0x52   : > { %p3147_p4 = pnand %p3145_p3, %p3142_p2 }
  0x54   : > { %3150 = shalt.err (!%p3147_p4)
}
  0x55   : > { %s3151_s21 = scalar_lea.vmem %s3666_s27, 16  ;;  %s3158_s16 = scalar_lea.vmem %s3666_s27, 32 }
  0x56   : > { %p3152_p7 = scmp.ne.s32.totalorder %s3666_s27, %s3151_s21  ;;  %p3159_p13 = scmp.lt.s32.totalorder %s3666_s27, %s3666_s27 }
  0x57   : > { %p3160_p1 = scmp.lt.s32.totalorder %s3158_s16, %s3151_s21 }
  0x58   : > { %p3154_p8 = pnand %p3152_p7, %p3678_p0 }
  0x59   : > { %p3161_p6 = por %p3160_p1, %p3159_p13 }
  0x5a   : > { %p3155_p11 = pneg %p3154_p8 }
  0x5c   : > { %p3162_p9 = pnand %p3161_p6, %p3155_p11 }
  0x5e   : > { %3165 = shalt.err (!%p3162_p9)
}
  0x5f   : > { %2853 = dma.hbm_to_vmem [thread:$0]  (!%p3662_p12), %s4237_s9, 16, %s3666_s27, [#allocation9]  }
  0x60   : > { %s3166_s1 = scalar_lea.hbm %s4185_s12, 2048 }
  0x61   : > { %p3167_p2 = scmp.ne.s32.totalorder %s4185_s12, %s3166_s1  ;;  %p3173_p7 = scmp.lt.u32.totalorder %s3166_s1, %s4185_s12 }
  0x63   : > { %p3169_p3 = pnand %p3167_p2, %p3678_p0 }
  0x65   : > { %p3170_p4 = pneg %p3169_p3 }
  0x67   : > { %p3175_p8 = pnand %p3173_p7, %p3170_p4 }
  0x69   : > { %3178 = shalt.err (!%p3175_p8)
}
  0x6a   : > { %s3179_s20 = scalar_lea.vmem %s587_s23, 2048  ;;  %p3187_p6 = scmp.lt.s32.totalorder %s587_s23, %s587_s23 }
  0x6b   : > { %p3180_p11 = scmp.ne.s32.totalorder %s587_s23, %s3179_s20  ;;  %p3188_p9 = scmp.lt.s32.totalorder %s3179_s20, %s3179_s20 }
  0x6d   : > { %p3182_p13 = pnand %p3180_p11, %p3678_p0  ;;  %p3189_p5 = por %p3188_p9, %p3187_p6 }
  0x6f   : > { %p3183_p1 = pneg %p3182_p13 }
  0x71   : > { %p3190_p10 = pnand %p3189_p5, %p3183_p1 }
  0x73   : > { %3193 = shalt.err (!%p3190_p10)
}
  0x74   : > { %s3483_s27 = smov 64   ;;  %s3484_s21 = smov 4  }
  0x75   : > { %2859 = dma.hbm_to_vmem [thread:$0]  (!%p3662_p12), %s4185_s12, 2048, %s587_s23, [#allocation12], %s3483_s27, %s3483_s27, %s3484_s21  }
  0x76   : > { %s3485_s18 = smov [#allocation14]   ;;  %s3486_s24 = smov [#allocation2]  }
  0x77   : > { %s614_s22 = sshll.u32 %s3485_s18, 4  ;;  %s513_s1 = sshll.u32 %s3486_s24, 4  ;;  %s615_s22 = int_to_ptr.vmem [resolvable:$true] %s614_s22  ;;  %s514_s1 = int_to_ptr.vmem [resolvable:$true] %s513_s1 }
  0x78   : > { %s3194_s26 = scalar_lea.hbm %s4188_s15, 16 }
  0x79   : > { %p3195_p5 = scmp.ne.s32.totalorder %s4188_s15, %s3194_s26  ;;  %p3201_p3 = scmp.lt.u32.totalorder %s3194_s26, %s4188_s15 }
  0x7b   : > { %p3197_p10 = pnand %p3195_p5, %p3678_p0 }
  0x7d   : > { %p3198_p2 = pneg %p3197_p10 }
  0x7f   : > { %p3203_p4 = pnand %p3201_p3, %p3198_p2 }
  0x81   : > { %3206 = shalt.err (!%p3203_p4)
}
  0x82   : > { %s3207_s23 = scalar_lea.vmem %s615_s22, 16  ;;  %s3214_s27 = scalar_lea.vmem %s615_s22, 32 }
  0x83   : > { %p3208_p7 = scmp.ne.s32.totalorder %s615_s22, %s3207_s23  ;;  %p3215_p13 = scmp.lt.s32.totalorder %s615_s22, %s615_s22 }
  0x84   : > { %p3216_p1 = scmp.lt.s32.totalorder %s3214_s27, %s3207_s23 }
  0x85   : > { %p3210_p8 = pnand %p3208_p7, %p3678_p0 }
  0x86   : > { %p3217_p6 = por %p3216_p1, %p3215_p13 }
  0x87   : > { %p3211_p11 = pneg %p3210_p8 }
  0x89   : > { %p3218_p9 = pnand %p3217_p6, %p3211_p11 }
  0x8b   : > { %3221 = shalt.err (!%p3218_p9)
}
  0x8c   : > { %2865 = dma.hbm_to_vmem [thread:$0]  (!%p3662_p12), %s4188_s15, 16, %s615_s22, [#allocation15]  }
  0x8d   : > { %s4238_s13 = sld [smem:[#allocation37_spill]] }
  0x93   : > { %s3222_s18 = scalar_lea.hbm %s4238_s13, 16 }
  0x94   : > { %p3223_p5 = scmp.ne.s32.totalorder %s4238_s13, %s3222_s18  ;;  %p3229_p3 = scmp.lt.u32.totalorder %s3222_s18, %s4238_s13 }
  0x96   : > { %p3225_p10 = pnand %p3223_p5, %p3678_p0 }
  0x98   : > { %p3226_p2 = pneg %p3225_p10 }
  0x9a   : > { %p3231_p4 = pnand %p3229_p3, %p3226_p2 }
  0x9c   : > { %3234 = shalt.err (!%p3231_p4)
}
  0x9d   : > { %s3235_s28 = scalar_lea.vmem %s514_s1, 16  ;;  %s3242_s22 = scalar_lea.vmem %s514_s1, 32 }
  0x9e   : > { %p3236_p7 = scmp.ne.s32.totalorder %s514_s1, %s3235_s28  ;;  %p3243_p13 = scmp.lt.s32.totalorder %s514_s1, %s514_s1 }
  0x9f   : > { %p3244_p1 = scmp.lt.s32.totalorder %s3242_s22, %s3235_s28 }
  0xa0   : > { %p3238_p8 = pnand %p3236_p7, %p3678_p0 }
  0xa1   : > { %p3245_p6 = por %p3244_p1, %p3243_p13 }
  0xa2   : > { %p3239_p11 = pneg %p3238_p8 }
  0xa4   : > { %p3246_p9 = pnand %p3245_p6, %p3239_p11 }
  0xa6   : > { %3249 = shalt.err (!%p3246_p9)
}
  0xa7   : > { %2844 = dma.hbm_to_vmem [thread:$0]  (!%p3662_p12), %s4238_s13, 16, %s514_s1, [#allocation3]  }
  0xa8   : > { %s3487_s27 = smov [#allocation7]   ;;  %s3488_s16 = smov [#allocation10]  }
  0xa9   : > { %s549_s21 = sshll.u32 %s3487_s27, 4  ;;  %s570_s9 = sshll.u32 %s3488_s16, 4  ;;  %s550_s21 = int_to_ptr.vmem [resolvable:$true] %s549_s21  ;;  %s571_s9 = int_to_ptr.vmem [resolvable:$true] %s570_s9 }
  0xaa   : > { %s4239_s8 = sld [smem:[#allocation40_spill]] }
  0xb0   : > { %s3250_s24 = scalar_lea.hbm %s4239_s8, 16 }
  0xb1   : > { %p3251_p5 = scmp.ne.s32.totalorder %s4239_s8, %s3250_s24  ;;  %p3257_p3 = scmp.lt.u32.totalorder %s3250_s24, %s4239_s8 }
  0xb3   : > { %p3253_p10 = pnand %p3251_p5, %p3678_p0 }
  0xb5   : > { %p3254_p2 = pneg %p3253_p10 }
  0xb7   : > { %p3259_p4 = pnand %p3257_p3, %p3254_p2 }
  0xb9   : > { %3262 = shalt.err (!%p3259_p4)
}
  0xba   : > { %s3263_s1 = scalar_lea.vmem %s550_s21, 16  ;;  %s3270_s22 = scalar_lea.vmem %s550_s21, 32 }
  0xbb   : > { %p3264_p7 = scmp.ne.s32.totalorder %s550_s21, %s3263_s1  ;;  %p3271_p13 = scmp.lt.s32.totalorder %s550_s21, %s550_s21 }
  0xbc   : > { %p3272_p1 = scmp.lt.s32.totalorder %s3270_s22, %s3263_s1 }
  0xbd   : > { %p3266_p8 = pnand %p3264_p7, %p3678_p0 }
  0xbe   : > { %p3273_p6 = por %p3272_p1, %p3271_p13 }
  0xbf   : > { %p3267_p11 = pneg %p3266_p8 }
  0xc1   : > { %p3274_p9 = pnand %p3273_p6, %p3267_p11 }
  0xc3   : > { %3277 = shalt.err (!%p3274_p9)
}
  0xc4   : > { %2850 = dma.hbm_to_vmem [thread:$0]  (!%p3662_p12), %s4239_s8, 16, %s550_s21, [#allocation6]  }
  0xc5   : > { %s3278_s0 = scalar_lea.hbm %s4183_s10, 2048 }
  0xc6   : > { %p3279_p5 = scmp.ne.s32.totalorder %s4183_s10, %s3278_s0  ;;  %p3285_p3 = scmp.lt.u32.totalorder %s3278_s0, %s4183_s10 }
  0xc8   : > { %p3281_p10 = pnand %p3279_p5, %p3678_p0 }
  0xca   : > { %p3282_p2 = pneg %p3281_p10 }
  0xcc   : > { %p3287_p4 = pnand %p3285_p3, %p3282_p2 }
  0xce   : > { %3290 = shalt.err (!%p3287_p4)
}
  0xcf   : > { %s3291_s26 = scalar_lea.vmem %s571_s9, 2048  ;;  %p3299_p13 = scmp.lt.s32.totalorder %s571_s9, %s571_s9 }
  0xd0   : > { %p3292_p7 = scmp.ne.s32.totalorder %s571_s9, %s3291_s26  ;;  %p3300_p1 = scmp.lt.s32.totalorder %s3291_s26, %s3291_s26 }
  0xd2   : > { %p3294_p8 = pnand %p3292_p7, %p3678_p0  ;;  %p3301_p6 = por %p3300_p1, %p3299_p13 }
  0xd4   : > { %p3295_p11 = pneg %p3294_p8 }
  0xd6   : > { %p3302_p9 = pnand %p3301_p6, %p3295_p11 }
  0xd8   : > { %3305 = shalt.err (!%p3302_p9)
}
  0xd9   : > { %s3489_s21 = smov 128   ;;  %s3490_s28 = smov 8  }
  0xda   : > { %2856 = dma.hbm_to_vmem [thread:$0]  (!%p3662_p12), %s4183_s10, 2048, %s571_s9, [#allocation9], %s3489_s21, %s3489_s21, %s3490_s28  }
  0xdb   : > { %s3491_s20 = smov [#allocation13]   ;;  %s3492_s27 = smov [#allocation16]  }
  0xdc   : > { %s603_s23 = sshll.u32 %s3491_s20, 4  ;;  %s628_s16 = sshll.u32 %s3492_s27, 4  ;;  %s604_s23 = int_to_ptr.vmem [resolvable:$true] %s603_s23  ;;  %s629_s16 = int_to_ptr.vmem [resolvable:$true] %s628_s16 }
  0xdd   : > { %s3306_s24 = scalar_lea.hbm %s4187_s14, 16 }
  0xde   : > { %p3307_p5 = scmp.ne.s32.totalorder %s4187_s14, %s3306_s24  ;;  %p3313_p3 = scmp.lt.u32.totalorder %s3306_s24, %s4187_s14 }
  0xe0   : > { %p3309_p10 = pnand %p3307_p5, %p3678_p0 }
  0xe2   : > { %p3310_p2 = pneg %p3309_p10 }
  0xe4   : > { %p3315_p4 = pnand %p3313_p3, %p3310_p2 }
  0xe6   : > { %3318 = shalt.err (!%p3315_p4)
}
  0xe7   : > { %s3319_s9 = scalar_lea.vmem %s604_s23, 16  ;;  %s3326_s21 = scalar_lea.vmem %s604_s23, 32 }
  0xe8   : > { %p3320_p7 = scmp.ne.s32.totalorder %s604_s23, %s3319_s9  ;;  %p3327_p13 = scmp.lt.s32.totalorder %s604_s23, %s604_s23 }
  0xe9   : > { %p3328_p1 = scmp.lt.s32.totalorder %s3326_s21, %s3319_s9 }
  0xea   : > { %p3322_p8 = pnand %p3320_p7, %p3678_p0 }
  0xeb   : > { %p3329_p6 = por %p3328_p1, %p3327_p13 }
  0xec   : > { %p3323_p11 = pneg %p3322_p8 }
  0xee   : > { %p3330_p9 = pnand %p3329_p6, %p3323_p11 }
  0xf0   : > { %3333 = shalt.err (!%p3330_p9)
}
  0xf1   : > { %2862 = dma.hbm_to_vmem [thread:$0]  (!%p3662_p12), %s4187_s14, 16, %s604_s23, [#allocation12]  }
  0xf2   : > { %s3334_s20 = scalar_lea.hbm %s4190_s17, 16 }
  0xf3   : > { %p3335_p5 = scmp.ne.s32.totalorder %s4190_s17, %s3334_s20  ;;  %p3341_p3 = scmp.lt.u32.totalorder %s3334_s20, %s4190_s17 }
  0xf5   : > { %p3337_p10 = pnand %p3335_p5, %p3678_p0 }
  0xf7   : > { %p3338_p2 = pneg %p3337_p10 }
  0xf9   : > { %p3343_p4 = pnand %p3341_p3, %p3338_p2 }
  0xfb   : > { %3346 = shalt.err (!%p3343_p4)
}
  0xfc   : > { %s3347_s3 = scalar_lea.vmem %s629_s16, 16  ;;  %s3354_s23 = scalar_lea.vmem %s629_s16, 32 }
  0xfd   : > { %p3348_p7 = scmp.ne.s32.totalorder %s629_s16, %s3347_s3  ;;  %p3355_p13 = scmp.lt.s32.totalorder %s629_s16, %s629_s16 }
  0xfe   : > { %p3356_p1 = scmp.lt.s32.totalorder %s3354_s23, %s3347_s3 }
  0xff   : > { %p3350_p8 = pnand %p3348_p7, %p3678_p0 }
 0x100   : > { %p3357_p6 = por %p3356_p1, %p3355_p13 }
 0x101   : > { %p3351_p11 = pneg %p3350_p8 }
 0x103   : > { %p3358_p9 = pnand %p3357_p6, %p3351_p11 }
 0x105   : > { %3361 = shalt.err (!%p3358_p9)
}
 0x106   : > { %2868 = dma.hbm_to_vmem [thread:$0]  (!%p3662_p12), %s4190_s17, 16, %s629_s16, [#allocation15]  }
 0x107   : > { %s3493_s9 = smov [#allocation17]   ;;  %s3362_s8 = scalar_lea.hbm %s4192_s19, 16 }
 0x108   : > { %s642_s21 = sshll.u32 %s3493_s9, 4  ;;  %p3363_p5 = scmp.ne.s32.totalorder %s4192_s19, %s3362_s8  ;;  %s643_s21 = int_to_ptr.vmem [resolvable:$true] %s642_s21 }
 0x109   : > { %p3369_p3 = scmp.lt.u32.totalorder %s3362_s8, %s4192_s19 }
 0x10a   : > { %p3365_p10 = pnand %p3363_p5, %p3678_p0 }
 0x10c   : > { %p3366_p2 = pneg %p3365_p10 }
 0x10e   : > { %p3371_p4 = pnand %p3369_p3, %p3366_p2 }
 0x110   : > { %3374 = shalt.err (!%p3371_p4)
}
 0x111   : > { %s3375_s16 = scalar_lea.vmem %s643_s21, 16  ;;  %s3382_s18 = scalar_lea.vmem %s643_s21, 32 }
 0x112   : > { %p3376_p7 = scmp.ne.s32.totalorder %s643_s21, %s3375_s16  ;;  %p3383_p13 = scmp.lt.s32.totalorder %s643_s21, %s643_s21 }
 0x113   : > { %p3384_p1 = scmp.lt.s32.totalorder %s3382_s18, %s3375_s16 }
 0x114   : > { %p3378_p8 = pnand %p3376_p7, %p3678_p0 }
 0x115   : > { %p3385_p6 = por %p3384_p1, %p3383_p13 }
 0x116   : > { %p3379_p11 = pneg %p3378_p8 }
 0x118   : > { %p3386_p9 = pnand %p3385_p6, %p3379_p11 }
 0x11a   : > { %3389 = shalt.err (!%p3386_p9)
}
 0x11b   : > { %2871 = dma.hbm_to_vmem [thread:$0]  (!%p3662_p12), %s4192_s19, 16, %s643_s21, [#allocation18]  }
 0x11c   : > { %p4240_p5 = scmp.ne.s32.totalorder %s4233_s30, 0 }
 0x11d   : > { %p4241_p10 = scmp.eq.s32.totalorder (!%p4240_p5), %s3624_s2, 0 }
 0x11e   : > { %668 = sbr.rel (%p4240_p5) target bundleno = 4102 (0x1006), region = 100 }
 0x125   : > { %3435 = dma.done.wait (%p4241_p10), [#allocation3], 16   ;;  %p4242_p0 = pmov %p4241_p10 }
 0x127   : > { %3437 = vsyncadd (%p4242_p0), [#allocation3], 4294967280  ;;  %p4243_p2 = pmov %p4242_p0 }
 0x128   : > { %p4244_p3 = pmov %p4242_p0 }
 0x129   : > { %3439 = dma.done.wait (%p4243_p2), [#allocation6], 6160  }
 0x12a   : > { %3441 = vsyncadd (%p4244_p3), [#allocation6], 4294961136  ;;  %p4245_p4 = pmov %p4242_p0 }
 0x12b   : > { %p4246_p12 = pmov %p4242_p0 }
 0x12c   : > { %3443 = dma.done.wait (%p4245_p4), [#allocation9], 2064  }
 0x12d   : > { %3445 = vsyncadd (%p4246_p12), [#allocation9], 4294965232  ;;  %p4247_p7 = pmov %p4242_p0 }
 0x12e   : > { %p4248_p8 = pmov %p4242_p0 }
 0x12f   : > { %3447 = dma.done.wait (%p4247_p7), [#allocation12], 2064  }
 0x130   : > { %3449 = vsyncadd (%p4248_p8), [#allocation12], 4294965232  ;;  %p4249_p11 = pmov %p4242_p0 }
 0x131   : > { %p4250_p13 = pmov %p4242_p0 }
 0x132   : > { %3451 = dma.done.wait (%p4249_p11), [#allocation15], 32  }
 0x133   : > { %3453 = vsyncadd (%p4250_p13), [#allocation15], 4294967264  ;;  %p4251_p1 = pmov %p4242_p0 }
 0x134   : > { %p4252_p6 = pmov %p4242_p0 }
 0x135   : > { %3455 = dma.done.wait (%p4251_p1), [#allocation18], 16  }
 0x136   : > { %3457 = vsyncadd (%p4252_p6), [#allocation18], 4294967280  ;;  %p763_p9 = scmp.lt.s32.totalorder %s3624_s2, 1  ;;  %s4253_s29 = sld [smem:[#allocation35_spill]]  ;;  %v2948_v1 = vld [vmem:[#allocation5 + $0x4] ss:$24 sps:$4 sm:$0xff]  }
 0x137   : > { %v2950_v2 = vld [vmem:[#allocation5] ss:$24 sps:$4 sm:$0xff]   ;;  %v2951_v3 = vld [vmem:[#allocation5 + $0xc] ss:$24 sps:$4 sm:$0xff]   ;;  %1128 = vmatprep.subr.bf16.mxu0 %v2948_v1  ;;  %v2956_v6 = vld [vmem:[#allocation5 + $0x30] ss:$24 sps:$4 sm:$0xff]   ;;  %v858_v1 = vlaneseq }
 0x138   : > { %s3896_s4 = scalar_select %p763_p9, %s3624_s2, 1  ;;  %v2953_v4 = vld [vmem:[#allocation5 + $0x8] ss:$24 sps:$4 sm:$0xff]   ;;  %v2954_v5 = vld [vmem:[#allocation5 + $0x34] ss:$24 sps:$4 sm:$0xff]   ;;  %1169 = vmatprep.subr.bf16.mxu1 %v2951_v3  ;;  %1129 = vmatpush1.bf16.msra.mxu0 %v2950_v2  ;;  %v3494_v31 = vmov 0  }
 0x139   : > { %v2957_v7 = vld [vmem:[#allocation5 + $0x3c] ss:$24 sps:$4 sm:$0xff]   ;;  %v2959_v8 = vld [vmem:[#allocation5 + $0x38] ss:$24 sps:$4 sm:$0xff]   ;;  %1170 = vmatpush1.bf16.msra.mxu1 %v2953_v4  ;;  %v2963_v10 = vld [vmem:[#allocation5 + $0x6c] ss:$24 sps:$4 sm:$0xff]   ;;  %1130 = vmatprep.subr.bf16.mxu0 %v2954_v5 }
 0x13a   : > { %s2500_s30 = sshll.u32 %s3896_s4, 3  ;;  %v2960_v9 = vld [vmem:[#allocation5 + $0x64] ss:$24 sps:$4 sm:$0xff]   ;;  %1171 = vmatprep.subr.bf16.mxu1 %v2957_v7  ;;  %v2962_v11 = vld [vmem:[#allocation5 + $0x60] ss:$24 sps:$4 sm:$0xff]   ;;  %1160 = vmatprep.mubr.bf16.mxu0 %v3494_v31  ;;  %s4254_s28 = sld [smem:[#allocation38_spill]] }
 0x13b   : > { %v2965_v16 = vld [vmem:[#allocation5 + $0x68] ss:$24 sps:$4 sm:$0xff]   ;;  %v2966_v17 = vld [vmem:[#allocation5 + $0x94] ss:$24 sps:$4 sm:$0xff]   ;;  %v2971_v20 = vld [vmem:[#allocation5 + $0x98] ss:$24 sps:$4 sm:$0xff]   ;;  %1201 = vmatprep.mubr.bf16.mxu1 %v3494_v31 }
 0x13c   : > { %s766_s26 = scalar_lea.vmem %s4253_s29, %s2500_s30  ;;  %1131 = vmatpush1.bf16.msra.mxu0 %v2956_v6  ;;  %v2968_v18 = vld [vmem:[#allocation5 + $0x90] ss:$24 sps:$4 sm:$0xff]   ;;  %v2969_v19 = vld [vmem:[#allocation5 + $0x9c] ss:$24 sps:$4 sm:$0xff]   ;;  %v2974_v22 = vld [vmem:[#allocation5 + $0xc0] ss:$24 sps:$4 sm:$0xff]  }
 0x13d   : > { %v771_v0 = vld [vmem:[%s766_s26] sm:$0xff]  ;;  %1172 = vmatpush1.bf16.msra.mxu1 %v2959_v8  ;;  %1132 = vmatprep.subr.bf16.mxu0 %v2960_v9  ;;  %v2978_v25 = vld [vmem:[#allocation5 + $0xf4] ss:$24 sps:$4 sm:$0xff]   ;;  %v2980_v27 = vld [vmem:[#allocation5 + $0xf0] ss:$24 sps:$4 sm:$0xff]   ;;  %vm3496_vm0 = vmmov 0  }
 0x13e   : > { %774 = vadd.xlane.f32.xlu0 %v771_v0  ;;  %1173 = vmatprep.subr.bf16.mxu1 %v2963_v10  ;;  %v2972_v21 = vld [vmem:[#allocation5 + $0xc4] ss:$24 sps:$4 sm:$0xff]   ;;  %v2977_v24 = vld [vmem:[#allocation5 + $0xc8] ss:$24 sps:$4 sm:$0xff]   ;;  %v2983_v28 = vld [vmem:[#allocation5 + $0xf8] ss:$24 sps:$4 sm:$0xff]  }
 0x13f   : > { %v2975_v23 = vld [vmem:[#allocation5 + $0xcc] ss:$24 sps:$4 sm:$0xff]   ;;  %v2981_v26 = vld [vmem:[#allocation5 + $0xfc] ss:$24 sps:$4 sm:$0xff]   ;;  %v2986_v32 = vld [vmem:[#allocation5 + $0x120] ss:$24 sps:$4 sm:$0xff]  }
 0x140   : > { %1133 = vmatpush1.bf16.msra.mxu0 %v2962_v11  ;;  %v2984_v29 = vld [vmem:[#allocation5 + $0x124] ss:$24 sps:$4 sm:$0xff]   ;;  %v2989_v33 = vld [vmem:[#allocation5 + $0x128] ss:$24 sps:$4 sm:$0xff]   ;;  %v2990_v34 = vld [vmem:[#allocation5 + $0x154] ss:$24 sps:$4 sm:$0xff]  }
 0x141   : > { %1174 = vmatpush1.bf16.msra.mxu1 %v2965_v16  ;;  %1134 = vmatprep.subr.bf16.mxu0 %v2966_v17  ;;  %v2987_v30 = vld [vmem:[#allocation5 + $0x12c] ss:$24 sps:$4 sm:$0xff]   ;;  %v2993_v35 = vld [vmem:[#allocation5 + $0x15c] ss:$24 sps:$4 sm:$0xff]   ;;  %v2992_v36 = vld [vmem:[#allocation5 + $0x150] ss:$24 sps:$4 sm:$0xff]  }
 0x142   : > { %1175 = vmatprep.subr.bf16.mxu1 %v2969_v19  ;;  %v2995_v37 = vld [vmem:[#allocation5 + $0x158] ss:$24 sps:$4 sm:$0xff]   ;;  %v2998_v38 = vld [vmem:[#allocation5 + $0x14] ss:$24 sps:$4 sm:$0xff]   ;;  %v2501_v43 = vld [vmem:[#allocation2] ss:$0 sm:$0xff] }
 0x143   : > { %v2502_v45 = vld [vmem:[%s4254_s28] ss:$0 sm:$0xff]  ;;  %v2996_v48 = vld [vmem:[#allocation5 + $0x10] ss:$24 sps:$4 sm:$0xff]   ;;  %v2999_v51 = vld [vmem:[#allocation5 + $0x40] ss:$24 sps:$4 sm:$0xff]  }
 0x144   : > { %1135 = vmatpush1.bf16.msra.mxu0 %v2968_v18  ;;  %v3001_v50 = vld [vmem:[#allocation5 + $0x44] ss:$24 sps:$4 sm:$0xff]   ;;  %v3004_v52 = vld [vmem:[#allocation5 + $0x74] ss:$24 sps:$4 sm:$0xff]   ;;  %v3002_v53 = vld [vmem:[#allocation5 + $0x70] ss:$24 sps:$4 sm:$0xff]  }
 0x145   : > { %1176 = vmatpush1.bf16.msra.mxu1 %v2971_v20  ;;  %1136 = vmatprep.subr.bf16.mxu0 %v2972_v21  ;;  %v3007_v54 = vld [vmem:[#allocation5 + $0xa4] ss:$24 sps:$4 sm:$0xff]   ;;  %v3005_v55 = vld [vmem:[#allocation5 + $0xa0] ss:$24 sps:$4 sm:$0xff]   ;;  %v3010_v56 = vld [vmem:[#allocation5 + $0xd4] ss:$24 sps:$4 sm:$0xff]  }
 0x146   : > { %1177 = vmatprep.subr.bf16.mxu1 %v2975_v23  ;;  %v3008_v57 = vld [vmem:[#allocation5 + $0xd0] ss:$24 sps:$4 sm:$0xff]   ;;  %v3013_v58 = vld [vmem:[#allocation5 + $0x104] ss:$24 sps:$4 sm:$0xff]   ;;  %v3011_v59 = vld [vmem:[#allocation5 + $0x100] ss:$24 sps:$4 sm:$0xff]  }
 0x147   : > { %v3016_v60 = vld [vmem:[#allocation5 + $0x134] ss:$24 sps:$4 sm:$0xff]   ;;  %v3014_v61 = vld [vmem:[#allocation5 + $0x130] ss:$24 sps:$4 sm:$0xff]   ;;  %v3019_v62 = vld [vmem:[#allocation5 + $0x164] ss:$24 sps:$4 sm:$0xff]  }
 0x148   : > { %1137 = vmatpush1.bf16.msra.mxu0 %v2974_v22  ;;  %v3017_v63 = vld [vmem:[#allocation5 + $0x160] ss:$24 sps:$4 sm:$0xff]   ;;  %v3918_v2 = vshrl.u32 %v858_v1, 7  ;;  %vm1346_vm1 = vcmask 1043456   ;;  %s4255_s27 = sld [smem:[#allocation36_spill]]  ;;  %vm1330_vm2 = vcmask 64512  }
 0x149   : > { %1178 = vmatpush1.bf16.msra.mxu1 %v2977_v24  ;;  %1138 = vmatprep.subr.bf16.mxu0 %v2978_v25  ;;  %v3924_v4 = vld [vmem:[%s4178_s5] sm:$0x3f]  ;;  %s4256_s16 = sld [smem:[#allocation42_spill]]  ;;  %s4257_s3 = sld [smem:[#allocation43_spill]] }
 0x14a   : > { %1179 = vmatprep.subr.bf16.mxu1 %v2981_v26  ;;  %v868_v3 = vsub.s32 2, %v3918_v2  ;;  %v860_v6 = vsub.s32 0, %v3918_v2  ;;  %v876_v20 = vsub.s32 4, %v3918_v2  ;;  %v880_v21 = vsub.s32 5, %v3918_v2  ;;  %s4258_s18 = sld [smem:[#allocation44_spill]]  ;;  %s4259_s1 = sld [smem:[#allocation28_spill]] }
 0x14b   : > { %s2626_s24 = sshll.u32 %s3624_s2, 4  ;;  %s4261_s29 = sld [smem:[#allocation45_spill]] }
 0x14c   : > { %1139 = vmatpush1.bf16.msra.mxu0 %v2980_v27  ;;  %v869_v5 = vrot.slane %v3924_v4, %v868_v3  ;;  %v877_v22 = vrot.slane %v3924_v4, %v876_v20  ;;  %v881_v23 = vrot.slane %v3924_v4, %v880_v21  ;;  %s3497_s21 = smov [#allocation19]  }
 0x14d   : > { %1180 = vmatpush1.bf16.msra.mxu1 %v2983_v28  ;;  %1140 = vmatprep.subr.bf16.mxu0 %v2984_v29  ;;  %s3394_s28 = sshll.u32 %s3497_s21, 4  ;;  %s3395_s28 = int_to_ptr.vmem [resolvable:$false] %s3394_s28 }
 0x14e   : > { %1181 = vmatprep.subr.bf16.mxu1 %v2987_v30  ;;  %s769_s0 = scalar_lea.vmem %s4255_s27, %s3896_s4 }
 0x150   : > { %1141 = vmatpush1.bf16.msra.mxu0 %v2986_v32 }
 0x151   : > { %1182 = vmatpush1.bf16.msra.mxu1 %v2989_v33  ;;  %1142 = vmatprep.subr.bf16.mxu0 %v2990_v34  ;;  %s4131_s26 = scalar_lea.hbm %s4261_s29, %s2626_s24 }
 0x152   : > { %1183 = vmatprep.subr.bf16.mxu1 %v2993_v35  ;;  %v3949_v35 = vld [vmem:[%s769_s0] ss:$0 sm:$0xff]  ;;  %s761_s0 = sand.u32 1, %s4259_s1   ;;  %s3396_s1 = scalar_lea.vmem %s3395_s28, 32 }
 0x153   : > { %s762_s4 = scalar_lea.vmem [#allocation19], %s761_s0  ;;  %s2302_s9 = scalar_lea.sflag [#allocation4], %s761_s0 }
 0x154   : > { %1143 = vmatpush1.bf16.msra.mxu0 %v2992_v36  ;;  %s2314_s30 = sshll.u32 %s762_s4, 4  ;;  %s4133_s30 = int_to_ptr.vmem [resolvable:$true] %s2314_s30 }
 0x155   : > { %1184 = vmatpush1.bf16.msra.mxu1 %v2995_v37  ;;  %1210 = vmatprep.subr.bf16.mxu0 %v2998_v38  ;;  %s3390_s2 = scalar_lea.vmem %s4133_s30, 16  ;;  %p3397_p3 = scmp.lt.s32.totalorder %s4133_s30, %s3395_s28 }
 0x156   : > { %p3391_p5 = scmp.ne.s32.totalorder %s4133_s30, %s3390_s2  ;;  %p3398_p4 = scmp.lt.s32.totalorder %s3396_s1, %s3390_s2 }
 0x158   : > { %p3399_p12 = por %p3398_p4, %p3397_p3 }
 0x1cb   : > { %v775_v12 = vpop.xlane.xlu0 %774 }
 0x1cc   : > { %v777_v13 = vmul.f32 0.0078125, %v775_v12  ;;  %v861_v12 = vrot.slane %v3924_v4, %v860_v6 }
 0x1ce   : > { %v778_v14 = vsub.f32 %v771_v0, %v777_v13  ;;  %v3495_v0 = vmov 0.0  }
 0x1cf   : > { %2695 = vmatprep.subr.bf16.mxu1 %v3495_v0 }
 0x1d0   : > { %v779_v15 = vmul.f32 %v778_v14, %v778_v14 }
 0x1d2   : > { %780 = vadd.xlane.f32.xlu0 %v779_v15 }
 0x25f   : > { %v781_v39 = vpop.xlane.xlu0 %780 }
 0x260   : > { %v782_v40 = vmul.f32 0.0078125, %v781_v39 }
 0x262   : > { %v783_v41 = vadd.f32 1e-12, %v782_v40 }
 0x264   : > { %3092 = vrsqrt.f32 %v783_v41 }
 0x26e   : > { %v3093_v42 = vpop.eup %3092 }
 0x26f   : > { %v785_v44 = vmul.f32 %v3093_v42, %v778_v14 }
 0x271   : > { %v792_v46 = vmul.f32 %v2501_v43, %v785_v44 }
 0x273   : > { %v3907_v47 = vadd.f32 %v2502_v45, %v792_v46 }
 0x275   : > { %v856_v49 = vpack.c.bf16 %v3907_v47, %v3907_v47 }
 0x277   : > { %1161 = vmatmul.mubr.bf16.vlgmr.msra.gmra.mrb[0].mxu0 %v856_v49  ;;  %1202 = vmatmul.mubr.bf16.vlgmr.msra.gmra.mrb[0].mxu1 %v856_v49 }
 0x278   : > { %1211 = vmatpush1.bf16.msra.mxu0 %v2996_v48  ;;  %1242 = vmatprep.mubr.bf16.mxu0 %v3494_v31 }
 0x279   : > { %1212 = vmatprep.subr.bf16.mxu0 %v3001_v50  ;;  %2697 = vmatprep.mubr.msk.bf16.mxu1 %vm3496_vm0, %v3495_v0 }
 0x27c   : > { %1213 = vmatpush1.bf16.msra.mxu0 %v2999_v51  ;;  %v3020_v51 = vld [vmem:[%s4179_s6] sm:$0xff]  }
 0x27d   : > { %1214 = vmatprep.subr.bf16.mxu0 %v3004_v52 }
 0x280   : > { %1215 = vmatpush1.bf16.msra.mxu0 %v3002_v53  ;;  %v3021_v53 = vld [vmem:[%s4179_s6 + $0x8] sm:$0xff]  }
 0x281   : > { %1216 = vmatprep.subr.bf16.mxu0 %v3007_v54  ;;  %v3022_v54 = vld [vmem:[%s4179_s6 + $0x10] sm:$0xff]  }
 0x284   : > { %1217 = vmatpush1.bf16.msra.mxu0 %v3005_v55  ;;  %v3023_v55 = vld [vmem:[%s4179_s6 + $0x18] sm:$0xff]  }
 0x285   : > { %1218 = vmatprep.subr.bf16.mxu0 %v3010_v56  ;;  %v3024_v56 = vld [vmem:[%s4179_s6 + $0x20] sm:$0xff]  }
 0x288   : > { %1219 = vmatpush1.bf16.msra.mxu0 %v3008_v57  ;;  %v3025_v57 = vld [vmem:[%s4179_s6 + $0x28] sm:$0xff]  }
 0x289   : > { %1220 = vmatprep.subr.bf16.mxu0 %v3013_v58  ;;  %v3026_v58 = vld [vmem:[%s4179_s6 + $0x30] sm:$0xff]  }
 0x28c   : > { %1221 = vmatpush1.bf16.msra.mxu0 %v3011_v59  ;;  %v3027_v59 = vld [vmem:[%s4179_s6 + $0x38] sm:$0xff]  }
 0x28d   : > { %1222 = vmatprep.subr.bf16.mxu0 %v3016_v60  ;;  %v872_v60 = vsub.s32 3, %v3918_v2 }
 0x290   : > { %1223 = vmatpush1.bf16.msra.mxu0 %v3014_v61  ;;  %v873_v61 = vrot.slane %v3924_v4, %v872_v60 }
 0x291   : > { %1224 = vmatprep.subr.bf16.mxu0 %v3019_v62  ;;  %v864_v62 = vsub.s32 1, %v3918_v2 }
 0x293   : > { %v865_v3 = vrot.slane %v3924_v4, %v864_v62 }
 0x294   : > { %1225 = vmatpush1.bf16.msra.mxu0 %v3017_v63 }
 0x295   : > { %2739 = vmatprep.subr.bf16.mxu0 %v3495_v0 }
 0x297   : > { %1243 = vmatmul.mubr.bf16.vlgmr.msra.gmra.mrb[4].mxu0 %v856_v49 }
 0x298   : > { %2755 = vmatprep.mubr.msk.bf16.mxu0 %vm3496_vm0, %v3495_v0 }
 0x34a   : > { %v1162_v7 = vpop.f32.mrb[0].mxu0  ;;  %v1203_v8 = vpop.f32.mrb[0].mxu1 }
 0x34b   : > { %v1204_v9 = vadd.f32 %v1203_v8, %v869_v5  ;;  %v3928_v10 = vpop.f32.mrb[1].mxu0  ;;  %v3930_v11 = vpop.f32.mrb[1].mxu1  ;;  %v1163_v18 = vadd.f32 %v1162_v7, %v861_v12 }
 0x34c   : > { %v1166_v13 = vpop.f32.mrb[2].mxu0  ;;  %v1207_v14 = vpop.f32.mrb[2].mxu1  ;;  %v1206_v63 = vadd.f32 %v3930_v11, %v873_v61 }
 0x34d   : > { %v1253_v15 = vpack.c.bf16 %v1204_v9, %v1204_v9  ;;  %v1167_v16 = vpop.f32.mrb[3].mxu0  ;;  %v1208_v17 = vpop.f32.mrb[3].mxu1  ;;  %v1251_v19 = vpack.c.bf16 %v1163_v18, %v1163_v18  ;;  %v1165_v13 = vadd.f32 %v3928_v10, %v865_v3  ;;  %v3050_v3 = vld [vmem:[#allocation10 + $0x44] ss:$8 sps:$4 sm:$0xff]  }
 0x34e   : > { %v1254_v8 = vpack.c.bf16 %v1206_v63, %v1206_v63 }
 0x34f   : > { %2696 = vmatpush3.bf16.xpose.msra.mxu1 %v1253_v15  ;;  %v1252_v11 = vpack.c.bf16 %v1165_v13, %v1165_v13  ;;  %v3059_v13 = vld [vmem:[#allocation10 + $0x74] ss:$8 sps:$4 sm:$0xff]  }
 0x350   : > { %2701 = vmatprep.subr.bf16.mxu1 %v3495_v0 }
 0x356   : > { %2698 = vmatmul.mubr.bf16.vlgmr.msra.gmra.mrb[4].mxu1 %v1251_v19 }
 0x357   : > { %2703 = vmatprep.mubr.msk.bf16.mxu1 %vm3496_vm0, %v3495_v0 }
 0x36a   : > { %v1244_v24 = vpop.f32.mrb[4].mxu0 }
 0x36b   : > { %v1245_v25 = vadd.f32 %v1244_v24, %v877_v22  ;;  %v1246_v26 = vpop.f32.mrb[5].mxu0 }
 0x36c   : > { %v1247_v27 = vadd.f32 %v1246_v26, %v881_v23  ;;  %v1248_v28 = vpop.f32.mrb[6].mxu0 }
 0x36d   : > { %v1255_v29 = vpack.c.bf16 %v1245_v25, %v1245_v25  ;;  %v1249_v30 = vpop.f32.mrb[7].mxu0  ;;  %v3029_v28 = vld [vmem:[%s4179_s6 + $0x48] sm:$0xff]  }
 0x36e   : > { %v1256_v32 = vpack.c.bf16 %v1247_v27, %v1247_v27  ;;  %v3028_v27 = vld [vmem:[%s4179_s6 + $0x40] sm:$0xff]   ;;  %v3031_v30 = vld [vmem:[%s4179_s6 + $0x58] sm:$0xff]  }
 0x36f   : > { %v1348_v33 = vsel %vm1346_vm1, %v1255_v29, 0  ;;  %2740 = vmatpush3.bf16.msra.mxu0 %v3028_v27  ;;  %v3030_v29 = vld [vmem:[%s4179_s6 + $0x50] sm:$0xff]  }
 0x370   : > { %v3942_v34 = vsel %vm1346_vm1, %v1256_v32, 0  ;;  %2702 = vmatpush3.bf16.msra.mxu1 %v1348_v33  ;;  %2741 = vmatprep.subr.bf16.mxu0 %v3495_v0  ;;  %v3032_v32 = vld [vmem:[%s4179_s6 + $0x60] sm:$0xff]   ;;  %v3033_v33 = vld [vmem:[%s4179_s6 + $0x68] sm:$0xff]   ;;  %v3065_v27 = vld [vmem:[#allocation11 + $0x10] sm:$0xff]  }
 0x371   : > { %2707 = vmatprep.subr.bf16.mxu1 %v3495_v0 }
 0x373   : > { %2742 = vmatpush3.bf16.msra.mxu0 %v3029_v28  ;;  %v3066_v28 = vld [vmem:[#allocation11 + $0x58] sm:$0xff]  }
 0x374   : > { %2743 = vmatprep.subr.bf16.mxu0 %v3495_v0 }
 0x377   : > { %2744 = vmatpush3.bf16.msra.mxu0 %v3030_v29  ;;  %v3067_v29 = vld [vmem:[#allocation11 + $0x18] sm:$0xff]  }
 0x378   : > { %2745 = vmatprep.subr.bf16.mxu0 %v3495_v0 }
 0x37b   : > { %2746 = vmatpush3.bf16.msra.mxu0 %v3031_v30  ;;  %v3068_v30 = vld [vmem:[#allocation11 + $0x60] sm:$0xff]  }
 0x37c   : > { %2747 = vmatprep.subr.bf16.mxu0 %v3495_v0 }
 0x37f   : > { %2748 = vmatpush3.bf16.msra.mxu0 %v3032_v32  ;;  %v3069_v32 = vld [vmem:[#allocation11 + $0x20] sm:$0xff]  }
 0x380   : > { %2749 = vmatprep.subr.bf16.mxu0 %v3495_v0 }
 0x383   : > { %2750 = vmatpush3.bf16.msra.mxu0 %v3033_v33  ;;  %v3070_v33 = vld [vmem:[#allocation11 + $0x68] sm:$0xff]  }
 0x384   : > { %2751 = vmatprep.subr.bf16.mxu0 %v3495_v0 }
 0x429   : > { %v1324_v36 = vpop.f32.mrb[4].mxu1 }
 0x42a   : > { %v1325_v37 = vadd.f32 %v3949_v35, %v1324_v36  ;;  %v2699_v38 = vpop.f32.mrb[5].mxu1 }
 0x42b   : > { %v1327_v39 = vpop.f32.mrb[6].mxu1 }
 0x42c   : > { %v2700_v40 = vpop.f32.mrb[7].mxu1  ;;  %v1331_v41 = vsel %vm1330_vm2, %v1325_v37, -inf  ;;  %v3035_v39 = vld [vmem:[%s4179_s6 + $0x78] sm:$0xff]  }
 0x42d   : > { %1332 = vmax.xlane.f32.xlu1 %v1331_v41 }
 0x4ba   : > { %v1333_v42 = vpop.xlane.xlu1 %1332 }
 0x4bb   : > { %v1334_v43 = vsub.f32 %v1325_v37, %v1333_v42 }
 0x4bd   : > { %v1335_v44 = vmul.f32 1.442695, %v1334_v43 }
 0x4bf   : > { %3094 = vpow2.f32 %v1335_v44 }
 0x4c9   : > { %v3095_v45 = vpop.eup %3094 }
 0x4ca   : > { %v1337_v46 = vsel %vm1330_vm2, %v3095_v45, 0.0 }
 0x4cb   : > { %1338 = vadd.xlane.f32.xlu1 %v1337_v46 }
 0x558   : > { %v1339_v48 = vpop.xlane.xlu1 %1338 }
 0x559   : > { %3096 = vrcp.f32 %v1339_v48 }
 0x563   : > { %v3097_v49 = vpop.eup %3096 }
 0x564   : > { %v1341_v50 = vmul.f32 %v3097_v49, %v3095_v45  ;;  %v2561_v45 = vld [vmem:[%s4180_s7] ss:$0 sm:$0xff] }
 0x566   : > { %v1342_v52 = vpack.c.bf16 %v1341_v50, %v1341_v50 }
 0x568   : > { %2704 = vmatmul.mubr.msk.bf16.vlgmr.msra.gmra.mrb[8].mxu1 %vm1330_vm2, %v1342_v52 }
 0x569   : > { %2708 = vmatpush3.bf16.msra.mxu1 %v3020_v51  ;;  %2723 = vmatprep.mubr.msk.bf16.mxu1 %vm3496_vm0, %v3495_v0 }
 0x56a   : > { %2709 = vmatprep.subr.bf16.mxu1 %v3495_v0 }
 0x56d   : > { %2710 = vmatpush3.bf16.msra.mxu1 %v3021_v53  ;;  %v3036_v53 = vld [vmem:[#allocation10] ss:$8 sps:$4 sm:$0xff]  }
 0x56e   : > { %2711 = vmatprep.subr.bf16.mxu1 %v3495_v0 }
 0x571   : > { %2712 = vmatpush3.bf16.msra.mxu1 %v3022_v54  ;;  %v3038_v54 = vld [vmem:[#allocation10 + $0x4] ss:$8 sps:$4 sm:$0xff]  }
 0x572   : > { %2713 = vmatprep.subr.bf16.mxu1 %v3495_v0 }
 0x575   : > { %2714 = vmatpush3.bf16.msra.mxu1 %v3023_v55  ;;  %v3041_v55 = vld [vmem:[#allocation10 + $0x14] ss:$8 sps:$4 sm:$0xff]  }
 0x576   : > { %2715 = vmatprep.subr.bf16.mxu1 %v3495_v0 }
 0x579   : > { %2716 = vmatpush3.bf16.msra.mxu1 %v3024_v56  ;;  %v3039_v56 = vld [vmem:[#allocation10 + $0x10] ss:$8 sps:$4 sm:$0xff]  }
 0x57a   : > { %2717 = vmatprep.subr.bf16.mxu1 %v3495_v0 }
 0x57d   : > { %2718 = vmatpush3.bf16.msra.mxu1 %v3025_v57  ;;  %v3044_v57 = vld [vmem:[#allocation10 + $0x24] ss:$8 sps:$4 sm:$0xff]  }
 0x57e   : > { %2719 = vmatprep.subr.bf16.mxu1 %v3495_v0 }
 0x581   : > { %2720 = vmatpush3.bf16.msra.mxu1 %v3026_v58  ;;  %v3042_v58 = vld [vmem:[#allocation10 + $0x20] ss:$8 sps:$4 sm:$0xff]  }
 0x582   : > { %2721 = vmatprep.subr.bf16.mxu1 %v3495_v0 }
 0x585   : > { %2722 = vmatpush3.bf16.msra.mxu1 %v3027_v59 }
 0x586   : > { %2727 = vmatprep.subr.bf16.mxu1 %v3495_v0 }
 0x63b   : > { %v1384_v1 = vpop.f32.mrb[8].mxu1 }
 0x63c   : > { %v1390_v5 = vpack.c.bf16 %v1384_v1, %v1384_v1  ;;  %v2705_v7 = vpop.f32.mrb[9].mxu1  ;;  %v3047_v1 = vld [vmem:[#allocation10 + $0x34] ss:$8 sps:$4 sm:$0xff]  }
 0x63d   : > { %v1387_v9 = vpop.f32.mrb[10].mxu1  ;;  %v3053_v7 = vld [vmem:[#allocation10 + $0x54] ss:$8 sps:$4 sm:$0xff]  }
 0x63e   : > { %v2706_v12 = vpop.f32.mrb[11].mxu1  ;;  %2724 = vmatmul.mubr.bf16.vlgmr.msra.gmra.mrb[12].mxu1 %v1390_v5  ;;  %v3048_v5 = vld [vmem:[#allocation10 + $0x40] ss:$8 sps:$4 sm:$0xff]   ;;  %v3056_v9 = vld [vmem:[#allocation10 + $0x64] ss:$8 sps:$4 sm:$0xff]  }
 0x63f   : > { %2728 = vmatpush3.bf16.xpose.msra.mxu1 %v1254_v8  ;;  %2729 = vmatprep.mubr.msk.bf16.mxu1 %vm3496_vm0, %v3495_v0  ;;  %v3051_v8 = vld [vmem:[#allocation10 + $0x50] ss:$8 sps:$4 sm:$0xff]   ;;  %v3054_v12 = vld [vmem:[#allocation10 + $0x60] ss:$8 sps:$4 sm:$0xff]  }
 0x640   : > { %2733 = vmatprep.subr.bf16.mxu1 %v3495_v0 }
 0x646   : > { %2730 = vmatmul.mubr.bf16.vlgmr.msra.gmra.mrb[16].mxu1 %v1252_v11  ;;  %v3057_v11 = vld [vmem:[#allocation10 + $0x70] ss:$8 sps:$4 sm:$0xff]  }
 0x647   : > { %2734 = vmatpush3.bf16.msra.mxu1 %v3942_v34  ;;  %2735 = vmatprep.mubr.msk.bf16.mxu1 %vm3496_vm0, %v3495_v0  ;;  %v3034_v34 = vld [vmem:[%s4179_s6 + $0x70] sm:$0xff]  }
 0x648   : > { %2752 = vmatpush3.bf16.msra.mxu0 %v3034_v34  ;;  %1811 = vmatprep.subr.bf16.mxu1 %v3038_v54  ;;  %v3071_v34 = vld [vmem:[#allocation11 + $0x28] sm:$0xff]  }
 0x649   : > { %2753 = vmatprep.subr.bf16.mxu0 %v3495_v0 }
 0x64c   : > { %2754 = vmatpush3.bf16.msra.mxu0 %v3035_v39  ;;  %v1718_v39 = vld [vmem:[%s4184_s11] sm:$0x3] }
 0x711   : > { %v1473_v4 = vpop.f32.mrb[12].mxu1 }
 0x712   : > { %v2725_v14 = vpop.f32.mrb[13].mxu1  ;;  %v1485_v46 = vadd.f32 %v2561_v45, %v1473_v4 }
 0x713   : > { %v1476_v15 = vpop.f32.mrb[14].mxu1 }
 0x714   : > { %v2726_v16 = vpop.f32.mrb[15].mxu1 }
 0x719   : > { %v1520_v17 = vpop.f32.mrb[16].mxu1 }
 0x71a   : > { %v1521_v18 = vadd.f32 %v3949_v35, %v1520_v17  ;;  %v2731_v19 = vpop.f32.mrb[17].mxu1  ;;  %v2571_v17 = vld [vmem:[#allocation7] ss:$0 sm:$0xff] }
 0x71b   : > { %v1523_v20 = vpop.f32.mrb[18].mxu1  ;;  %v2572_v19 = vld [vmem:[#allocation8] ss:$0 sm:$0xff] }
 0x71c   : > { %v2732_v21 = vpop.f32.mrb[19].mxu1  ;;  %v1526_v10 = vsel %vm1330_vm2, %v1521_v18, -inf }
 0x71d   : > { %1527 = vmax.xlane.f32.xlu0 %v1526_v10 }
 0x7aa   : > { %v1528_v22 = vpop.xlane.xlu0 %1527 }
 0x7ab   : > { %v1529_v23 = vsub.f32 %v1521_v18, %v1528_v22  ;;  %v3060_v22 = vld [vmem:[#allocation11 + $0x40] sm:$0xff]  }
 0x7ac   : > { %2655 = vmatprep.subr.bf16.mxu0 %v3060_v22  ;;  %v3082_v22 = vld [vmem:[%s4257_s3 + $0x30] sm:$0xff]  }
 0x7ad   : > { %v1530_v24 = vmul.f32 1.442695, %v1529_v23  ;;  %v3061_v23 = vld [vmem:[#allocation11] sm:$0xff]  }
 0x7af   : > { %3098 = vpow2.f32 %v1530_v24  ;;  %v3062_v24 = vld [vmem:[#allocation11 + $0x48] sm:$0xff]  }
 0x7b9   : > { %v3099_v25 = vpop.eup %3098 }
 0x7ba   : > { %v1532_v26 = vsel %vm1330_vm2, %v3099_v25, 0.0 }
 0x7bb   : > { %1533 = vadd.xlane.f32.xlu1 %v1532_v26  ;;  %v3064_v26 = vld [vmem:[#allocation11 + $0x50] sm:$0xff]  }
 0x848   : > { %v1534_v35 = vpop.xlane.xlu1 %1533 }
 0x849   : > { %3100 = vrcp.f32 %v1534_v35  ;;  %v3072_v35 = vld [vmem:[#allocation11 + $0x70] sm:$0xff]  }
 0x853   : > { %v3101_v36 = vpop.eup %3100 }
 0x854   : > { %v1536_v37 = vmul.f32 %v3101_v36, %v3099_v25  ;;  %v3063_v25 = vld [vmem:[#allocation11 + $0x8] sm:$0xff]   ;;  %v3073_v36 = vld [vmem:[#allocation11 + $0x30] sm:$0xff]  }
 0x856   : > { %v1537_v38 = vpack.c.bf16 %v1536_v37, %v1536_v37  ;;  %v3074_v37 = vld [vmem:[#allocation11 + $0x78] sm:$0xff]  }
 0x858   : > { %2736 = vmatmul.mubr.msk.bf16.vlgmr.msra.gmra.mrb[20].mxu1 %vm1330_vm2, %v1537_v38  ;;  %v3075_v38 = vld [vmem:[#allocation11 + $0x38] sm:$0xff]  }
 0x859   : > { %1843 = vmatprep.mubr.bf16.mxu1 %v3494_v31  ;;  %1812 = vmatpush1.bf16.msra.mxu1 %v3036_v53 }
 0x85a   : > { %1813 = vmatprep.subr.bf16.mxu1 %v3041_v55 }
 0x85d   : > { %1814 = vmatpush1.bf16.msra.mxu1 %v3039_v56 }
 0x85e   : > { %1815 = vmatprep.subr.bf16.mxu1 %v3044_v57 }
 0x861   : > { %1816 = vmatpush1.bf16.msra.mxu1 %v3042_v58 }
 0x862   : > { %1817 = vmatprep.subr.bf16.mxu1 %v3047_v1 }
 0x92b   : > { %v1578_v40 = vpop.f32.mrb[20].mxu1 }
 0x92c   : > { %v1584_v41 = vpack.c.bf16 %v1578_v40, %v1578_v40  ;;  %v2737_v42 = vpop.f32.mrb[21].mxu1  ;;  %v1724_v40 = vrot.slane %v1718_v39, %v860_v6 }
 0x92d   : > { %v1581_v43 = vpop.f32.mrb[22].mxu1 }
 0x92e   : > { %v2738_v44 = vpop.f32.mrb[23].mxu1  ;;  %2756 = vmatmul.mubr.bf16.vlgmr.msra.gmra.mrb[8].mxu0 %v1584_v41  ;;  %v1728_v41 = vrot.slane %v1718_v39, %v864_v62 }
 0x92f   : > { %2656 = vmatpush3.bf16.msra.mxu0 %v3061_v23  ;;  %v3083_v23 = vld [vmem:[%s4257_s3 + $0x38] sm:$0xff]  }
 0x930   : > { %2657 = vmatprep.subr.bf16.mxu0 %v3062_v24  ;;  %v3084_v24 = vld [vmem:[%s4258_s18] sm:$0xff]  }
 0x933   : > { %2658 = vmatpush3.bf16.msra.mxu0 %v3063_v25  ;;  %v3085_v25 = vld [vmem:[%s4258_s18 + $0x8] sm:$0xff]  }
 0x934   : > { %2659 = vmatprep.subr.bf16.mxu0 %v3064_v26  ;;  %v3086_v26 = vld [vmem:[%s4258_s18 + $0x10] sm:$0xff]  }
 0x937   : > { %2660 = vmatpush3.bf16.msra.mxu0 %v3065_v27  ;;  %v3087_v27 = vld [vmem:[%s4258_s18 + $0x18] sm:$0xff]  }
 0x938   : > { %2661 = vmatprep.subr.bf16.mxu0 %v3066_v28  ;;  %v3088_v28 = vld [vmem:[%s4258_s18 + $0x20] sm:$0xff]  }
 0x93b   : > { %2662 = vmatpush3.bf16.msra.mxu0 %v3067_v29  ;;  %v3089_v29 = vld [vmem:[%s4258_s18 + $0x28] sm:$0xff]  }
 0x93c   : > { %2663 = vmatprep.subr.bf16.mxu0 %v3068_v30 }
 0x93f   : > { %2664 = vmatpush3.bf16.msra.mxu0 %v3069_v32 }
 0x940   : > { %2665 = vmatprep.subr.bf16.mxu0 %v3070_v33 }
 0x943   : > { %2666 = vmatpush3.bf16.msra.mxu0 %v3071_v34 }
 0x944   : > { %2667 = vmatprep.subr.bf16.mxu0 %v3072_v35  ;;  %v2606_v35 = vld [vmem:[#allocation13] ss:$0 sm:$0xff] }
 0x947   : > { %2668 = vmatpush3.bf16.msra.mxu0 %v3073_v36 }
 0x948   : > { %2669 = vmatprep.subr.bf16.mxu0 %v3074_v37  ;;  %v2607_v37 = vld [vmem:[#allocation14] ss:$0 sm:$0xff] }
 0x94b   : > { %2670 = vmatpush3.bf16.msra.mxu0 %v3075_v38 }
 0x94c   : > { %2779 = vmatprep.subr.bf16.mxu0 %v3495_v0 }
 0xa01   : > { %v1667_v48 = vpop.f32.mrb[8].mxu0 }
 0xa02   : > { %v1673_v49 = vadd.f32 %v1667_v48, %v1485_v46  ;;  %v2757_v50 = vpop.f32.mrb[9].mxu0 }
 0xa03   : > { %v1670_v31 = vpop.f32.mrb[10].mxu0 }
 0xa04   : > { %v2758_v51 = vpop.f32.mrb[11].mxu0  ;;  %v1674_v52 = vadd.f32 %v1673_v49, %v3907_v47  ;;  %v3045_v47 = vld [vmem:[#allocation10 + $0x30] ss:$8 sps:$4 sm:$0xff]  }
 0xa05   : > { %1818 = vmatpush1.bf16.msra.mxu1 %v3045_v47 }
 0xa06   : > { %1677 = vadd.xlane.f32.xlu0 %v1674_v52  ;;  %1819 = vmatprep.subr.bf16.mxu1 %v3050_v3 }
 0xa09   : > { %1820 = vmatpush1.bf16.msra.mxu1 %v3048_v5  ;;  %v2589_v5 = vld [vmem:[%s4256_s16] ss:$0 sm:$0xff]  ;;  %s4260_s16 = sld [smem:[#allocation33_spill]] }
 0xa0a   : > { %1821 = vmatprep.subr.bf16.mxu1 %v3053_v7 }
 0xa0d   : > { %1822 = vmatpush1.bf16.msra.mxu1 %v3051_v8 }
 0xa0e   : > { %1823 = vmatprep.subr.bf16.mxu1 %v3056_v9 }
 0xa0f   : > { %p4262_p10 = scmp.ne.s32.totalorder %s4260_s16, 0 }
 0xa11   : > { %1824 = vmatpush1.bf16.msra.mxu1 %v3054_v12  ;;  %p3392_p0 = pnand %p3391_p5, %p4262_p10 }
 0xa12   : > { %1825 = vmatprep.subr.bf16.mxu1 %v3059_v13 }
 0xa13   : > { %p3393_p2 = pneg %p3392_p0 }
 0xa15   : > { %1826 = vmatpush1.bf16.msra.mxu1 %v3057_v11  ;;  %p3400_p7 = pnand %p3399_p12, %p3393_p2 }
 0xa16   : > { %2759 = vmatprep.subr.bf16.mxu1 %v3495_v0 }
 0xa93   : > { %v1678_v59 = vpop.xlane.xlu0 %1677 }
 0xa94   : > { %v1679_v60 = vmul.f32 0.0078125, %v1678_v59 }
 0xa96   : > { %v1680_v61 = vsub.f32 %v1674_v52, %v1679_v60 }
 0xa98   : > { %v1681_v63 = vmul.f32 %v1680_v61, %v1680_v61 }
 0xa9a   : > { %1682 = vadd.xlane.f32.xlu1 %v1681_v63 }
 0xb27   : > { %v1683_v4 = vpop.xlane.xlu1 %1682 }
 0xb28   : > { %v1684_v14 = vmul.f32 0.0078125, %v1683_v4  ;;  %v3076_v4 = vld [vmem:[%s4257_s3] sm:$0xff]  }
 0xb2a   : > { %v1685_v15 = vadd.f32 1e-12, %v1684_v14  ;;  %v3077_v14 = vld [vmem:[%s4257_s3 + $0x8] sm:$0xff]  }
 0xb2c   : > { %3102 = vrsqrt.f32 %v1685_v15 }
 0xb36   : > { %v3103_v16 = vpop.eup %3102 }
 0xb37   : > { %v1687_v18 = vmul.f32 %v3103_v16, %v1680_v61 }
 0xb39   : > { %v1694_v20 = vmul.f32 %v2571_v17, %v1687_v18 }
 0xb3b   : > { %v4044_v21 = vadd.f32 %v2572_v19, %v1694_v20  ;;  %v3078_v19 = vld [vmem:[%s4257_s3 + $0x10] sm:$0xff]   ;;  %v3079_v20 = vld [vmem:[%s4257_s3 + $0x18] sm:$0xff]  }
 0xb3d   : > { %v1719_v10 = vpack.c.bf16 %v4044_v21, %v4044_v21 }
 0xb3f   : > { %1844 = vmatmul.mubr.bf16.vlgmr.msra.gmra.mrb[24].mxu1 %v1719_v10  ;;  %v3081_v10 = vld [vmem:[%s4257_s3 + $0x28] sm:$0xff]  }
 0xb40   : > { %2775 = vmatprep.mubr.msk.bf16.mxu1 %vm3496_vm0, %v3495_v0  ;;  %2760 = vmatpush3.bf16.msra.mxu1 %v3076_v4 }
 0xb41   : > { %2761 = vmatprep.subr.bf16.mxu1 %v3495_v0 }
 0xb44   : > { %2762 = vmatpush3.bf16.msra.mxu1 %v3077_v14 }
 0xb45   : > { %2763 = vmatprep.subr.bf16.mxu1 %v3495_v0 }
 0xb48   : > { %2764 = vmatpush3.bf16.msra.mxu1 %v3078_v19 }
 0xb49   : > { %2765 = vmatprep.subr.bf16.mxu1 %v3495_v0 }
 0xb4c   : > { %2766 = vmatpush3.bf16.msra.mxu1 %v3079_v20 }
 0xb4d   : > { %2767 = vmatprep.subr.bf16.mxu1 %v3495_v0 }
 0xc12   : > { %v1845_v42 = vpop.f32.mrb[24].mxu1 }
 0xc13   : > { %v1846_v43 = vadd.f32 %v1845_v42, %v1724_v40  ;;  %v1847_v44 = vpop.f32.mrb[25].mxu1  ;;  %v3091_v42 = vld [vmem:[%s4258_s18 + $0x38] sm:$0xff]  }
 0xc14   : > { %v1848_v45 = vadd.f32 %v1847_v44, %v1728_v41  ;;  %v1849_v46 = vpop.f32.mrb[26].mxu1  ;;  %v3090_v41 = vld [vmem:[%s4258_s18 + $0x30] sm:$0xff]  }
 0xc15   : > { %v1852_v48 = vmul.f32 %v1846_v43, %v1846_v43  ;;  %v1850_v49 = vpop.f32.mrb[27].mxu1 }
 0xc16   : > { %v1853_v50 = vmul.f32 %v1848_v45, %v1848_v45 }
 0xc17   : > { %v1854_v31 = vmul.f32 %v1852_v48, %v1846_v43 }
 0xc18   : > { %v1855_v51 = vmul.f32 %v1853_v50, %v1848_v45 }
 0xc19   : > { %v1856_v52 = vmul.f32 0.044715, %v1854_v31 }
 0xc1a   : > { %v1857_v53 = vmul.f32 0.044715, %v1855_v51  ;;  %v2617_v51 = vld [vmem:[#allocation17] ss:$0 sm:$0xff] }
 0xc1b   : > { %v1858_v54 = vadd.f32 %v1856_v52, %v1846_v43 }
 0xc1c   : > { %v1859_v55 = vadd.f32 %v1857_v53, %v1848_v45 }
 0xc1d   : > { %v1860_v56 = vmul.f32 0.7978846, %v1858_v54 }
 0xc1e   : > { %v1861_v57 = vmul.f32 0.7978846, %v1859_v55 }
 0xc1f   : > { %3104 = vtanh.f32 %v1860_v56 }
 0xc20   : > { %3106 = vtanh.f32 %v1861_v57 }
 0xc29   : > { %v3105_v2 = vpop.eup %3104 }
 0xc2a   : > { %v3107_v6 = vpop.eup %3106  ;;  %v1864_v62 = vadd.f32 1.0, %v3105_v2 }
 0xc2b   : > { %v1865_v58 = vadd.f32 1.0, %v3107_v6 }
 0xc2c   : > { %v1866_v59 = vmul.f32 0.5, %v1864_v62 }
 0xc2d   : > { %v1867_v60 = vmul.f32 0.5, %v1865_v58 }
 0xc2e   : > { %v1868_v61 = vmul.f32 %v1866_v59, %v1846_v43  ;;  %v2608_v43 = vld [vmem:[#allocation16] ss:$0 sm:$0xff] }
 0xc2f   : > { %v1869_v63 = vmul.f32 %v1867_v60, %v1848_v45 }
 0xc30   : > { %v1903_v47 = vpack.c.bf16 %v1868_v61, %v1868_v61 }
 0xc31   : > { %v1904_v1 = vpack.c.bf16 %v1869_v63, %v1869_v63 }
 0xc33   : > { %2039 = vmatprep.mubr.bf16.mxu0 %v1904_v1 }
 0xc34   : > { %2040 = vmatmul.mubr.bf16.vlgmr.msra.gmra.mrb[12].mxu0 %v1903_v47 }
 0xc35   : > { %2795 = vmatprep.mubr.msk.bf16.mxu0 %vm3496_vm0, %v3495_v0  ;;  %2780 = vmatpush3.bf16.msra.mxu0 %v3084_v24 }
 0xc36   : > { %2781 = vmatprep.subr.bf16.mxu0 %v3495_v0 }
 0xc39   : > { %2782 = vmatpush3.bf16.msra.mxu0 %v3085_v25 }
 0xc3a   : > { %2783 = vmatprep.subr.bf16.mxu0 %v3495_v0 }
 0xc3d   : > { %2784 = vmatpush3.bf16.msra.mxu0 %v3086_v26 }
 0xc3e   : > { %2785 = vmatprep.subr.bf16.mxu0 %v3495_v0 }
 0xc41   : > { %2786 = vmatpush3.bf16.msra.mxu0 %v3087_v27 }
 0xc42   : > { %2787 = vmatprep.subr.bf16.mxu0 %v3495_v0 }
 0xc45   : > { %2788 = vmatpush3.bf16.msra.mxu0 %v3088_v28 }
 0xc46   : > { %2789 = vmatprep.subr.bf16.mxu0 %v3495_v0 }
 0xc49   : > { %2790 = vmatpush3.bf16.msra.mxu0 %v3089_v29 }
 0xc4a   : > { %2791 = vmatprep.subr.bf16.mxu0 %v3495_v0 }
 0xc4d   : > { %2792 = vmatpush3.bf16.msra.mxu0 %v3090_v41 }
 0xc4e   : > { %2793 = vmatprep.subr.bf16.mxu0 %v3495_v0 }
 0xc51   : > { %2794 = vmatpush3.bf16.msra.mxu0 %v3091_v42 }
 0xd07   : > { %v2671_v3 = vpop.f32.mrb[12].mxu0 }
 0xd08   : > { %v2672_v7 = vpop.f32.mrb[13].mxu0 }
 0xd09   : > { %v2673_v8 = vadd.f32 %v2672_v7, %v2671_v3  ;;  %v2674_v9 = vpop.f32.mrb[14].mxu0 }
 0xd0a   : > { %v2675_v12 = vpop.f32.mrb[15].mxu0 }
 0xd0b   : > { %v2042_v13 = vadd.f32 %v2673_v8, %v2589_v5 }
 0xd0d   : > { %v2047_v11 = vadd.f32 %v2042_v13, %v4044_v21  ;;  %v3080_v21 = vld [vmem:[%s4257_s3 + $0x20] sm:$0xff]  }
 0xd0e   : > { %2768 = vmatpush3.bf16.msra.mxu1 %v3080_v21 }
 0xd0f   : > { %2050 = vadd.xlane.f32.xlu0 %v2047_v11  ;;  %2769 = vmatprep.subr.bf16.mxu1 %v3495_v0 }
 0xd12   : > { %2770 = vmatpush3.bf16.msra.mxu1 %v3081_v10 }
 0xd13   : > { %2771 = vmatprep.subr.bf16.mxu1 %v3495_v0 }
 0xd16   : > { %2772 = vmatpush3.bf16.msra.mxu1 %v3082_v22 }
 0xd17   : > { %2773 = vmatprep.subr.bf16.mxu1 %v3495_v0 }
 0xd1a   : > { %2774 = vmatpush3.bf16.msra.mxu1 %v3083_v23 }
 0xd9c   : > { %v2051_v15 = vpop.xlane.xlu0 %2050 }
 0xd9d   : > { %v2052_v16 = vmul.f32 0.0078125, %v2051_v15 }
 0xd9f   : > { %v2053_v17 = vsub.f32 %v2047_v11, %v2052_v16 }
 0xda1   : > { %v2054_v18 = vmul.f32 %v2053_v17, %v2053_v17 }
 0xda3   : > { %2055 = vadd.xlane.f32.xlu1 %v2054_v18 }
 0xe30   : > { %v2056_v30 = vpop.xlane.xlu1 %2055 }
 0xe31   : > { %v2057_v32 = vmul.f32 0.0078125, %v2056_v30 }
 0xe33   : > { %v2058_v33 = vadd.f32 1e-12, %v2057_v32 }
 0xe35   : > { %3108 = vrsqrt.f32 %v2058_v33 }
 0xe3f   : > { %v3109_v34 = vpop.eup %3108 }
 0xe40   : > { %v2060_v36 = vmul.f32 %v3109_v34, %v2053_v17 }
 0xe42   : > { %v2067_v38 = vmul.f32 %v2606_v35, %v2060_v36 }
 0xe44   : > { %v2074_v39 = vadd.f32 %v2607_v37, %v2067_v38 }
 0xe46   : > { %v2092_v40 = vpack.c.bf16 %v2074_v39, %v2074_v39 }
 0xe48   : > { %2776 = vmatmul.mubr.bf16.vlgmr.msra.gmra.mrb[28].mxu1 %v2092_v40 }
 0xf1b   : > { %v2181_v44 = vpop.f32.mrb[28].mxu1 }
 0xf1c   : > { %v2182_v45 = vadd.f32 %v2608_v43, %v2181_v44  ;;  %v2777_v46 = vpop.f32.mrb[29].mxu1 }
 0xf1d   : > { %v2184_v48 = vpop.f32.mrb[30].mxu1 }
 0xf1e   : > { %v2187_v49 = vmax.f32 %v2182_v45, 0.0  ;;  %v2778_v50 = vpop.f32.mrb[31].mxu1 }
 0xf20   : > { %v2205_v31 = vpack.c.bf16 %v2187_v49, %v2187_v49 }
 0xf22   : > { %2796 = vmatmul.mubr.bf16.vlgmr.msra.gmra.mrb[16].mxu0 %v2205_v31 }
 0xff5   : > { %v2294_v0 = vpop.f32.mrb[16].mxu0 }
 0xff6   : > { %v2295_v52 = vadd.f32 %v2617_v51, %v2294_v0  ;;  %v2797_v53 = vpop.f32.mrb[17].mxu0 }
 0xff7   : > { %v2297_v54 = vpop.f32.mrb[18].mxu0 }
 0xff8   : > { %2300 = vst [vmem:[%s762_s4] sm:$0x1] %v2295_v52  ;;  %v2798_v55 = vpop.f32.mrb[19].mxu0 }
 0xff9   : > { %3403 = shalt.err (!%p3400_p7)
}
 0xffa   : > { %s3404_s8 = scalar_lea.hbm %s4131_s26, 16  ;;  %s3408_s27 = scalar_lea.hbm %s4261_s29, 32 }
 0xffb   : > { %p3405_p8 = scmp.ne.s32.totalorder %s4131_s26, %s3404_s8  ;;  %p3409_p1 = scmp.lt.u32.totalorder %s4131_s26, %s4261_s29 }
 0xffc   : > { %p3410_p6 = scmp.lt.u32.totalorder %s3408_s27, %s3404_s8  ;;  %p3412_p5 = scmp.lt.u32.totalorder %s3404_s8, %s4131_s26 }
 0xffd   : > { %p3406_p11 = pnand %p3405_p8, %p4262_p10 }
 0xffe   : > { %p3411_p9 = por %p3410_p6, %p3409_p1 }
 0xfff   : > { %p3407_p13 = pneg %p3406_p11 }
0x1000   : > { %p3413_p0 = por %p3412_p5, %p3411_p9 }
0x1002   : > { %p3414_p2 = pnand %p3413_p0, %p3407_p13 }
0x1004   : > { %3417 = shalt.err (!%p3414_p2)
}
0x1005   : > { %2839 = dma.vmem_to_hbm [thread:$0]  (%p4262_p10), %s4133_s30, 16, %s4131_s26, %s2302_s9  }
0x1006 PF: > { %s4263_s4 = sld [smem:[#allocation30_spill]]  ;;  %s4264_s25 = sld [smem:[#allocation27_spill]] }
0x1007   : > { %s4265_s23 = sld [smem:[#allocation34_spill]] }
0x100c   : > { %p2896_p3 = scmp.ge.s32.totalorder %s4263_s4, 2  ;;  %s2326_s2 = sand.u32 1, %s4264_s25  }
0x100d   : > { %p4266_p4 = scmp.ne.s32.totalorder %s4265_s23, 0  ;;  %s2327_s21 = scalar_lea.sflag [#allocation4], %s2326_s2 }
0x100f   : > { %p2873_p12 = pnand %p2896_p3, %p4266_p4 }
0x1011   : > { %3459 = dma.done.wait (!%p2873_p12), %s2327_s21, 16  }
0x1012   : > { %3461 = vsyncadd (!%p2873_p12), %s2327_s21, 4294967280  ;;  %s4267_s24 = sld [smem:[#allocation31_spill]]  ;;  %s4268_s1 = sld [smem:[#allocation28_spill]] }
0x1013   : > { %s4269_s22 = sld [smem:[#allocation29_spill]]  ;;  %s4270_s23 = sld [smem:[#allocation32_spill]] }
0x1018   : > { %p36_p7 = scmp.ge.s32.totalorder %s4267_s24, 4  }
0x101a   :  { %38 = sbr.rel (!%p36_p7) target bundleno = 21 (0x15), region = 179 }
0x1021   :  { %2331 = vsyncpa [#allocation3], 1 }
0x1022   :  { %2333 = vsyncpa [#allocation3 + $0x1], 1 }
0x1023   :  { %2334 = vsyncpa [#allocation6], 1 }
0x1024   :  { %2335 = vsyncpa [#allocation9], 1 }
0x1025   :  { %2336 = vsyncpa [#allocation12], 1 }
0x1026   :  { %2337 = vsyncpa [#allocation15], 1 }
0x1027   :  { %2338 = vsyncpa [#allocation18], 1 }
0x1028   :  { %2339 = vsyncpa [#allocation4], 1 }
0x1029   :  { %2341 = vsyncpa [#allocation4 + $0x1], 1 }

</bundles_post_ra>
